<compile_context>
chip_gen: v7x
topology: tpu7x:2x2x1
jax: 0.10.0
libtpu: 0.0.40
codegen_flags: <defaults>
</compile_context>

<pallas_src>
import jax
import jax.numpy as jnp
from jax.experimental import pallas as pl
from jax.experimental.pallas import tpu as pltpu


def _round_up(x, m):
    return ((x + m - 1) // m) * m


def gru_relu_kernel(x_ref, wih_ref, whh_ref, bcomb_ref, bhn_ref, out_ref, gi_ref):
    """One batch block per grid step; the full time recurrence runs inside.

    Layouts (time-major, gate blocks padded to Hp = round_up(H, 128) lanes):
      x_ref    : (T, bb, F)     bf16
      wih_ref  : (F, 3*Hp)      bf16   [r | z | n] column blocks
      whh_ref  : (Hp, 3*Hp)     bf16
      bcomb_ref: (1, 3*Hp)      f32    [b_ir+b_hr | b_iz+b_hz | b_in]
      bhn_ref  : (1, Hp)        f32
      out_ref  : (T, bb, Hp)    f32    relu(h_t), time-major
      gi_ref   : (T, bb, 3*Hp)  f32    scratch: hoisted input projection
    """
    T, bb, F = x_ref.shape
    Hp = out_ref.shape[-1]

    # ---- 1) Input projection for ALL timesteps in one MXU pass (off the serial
    #         path).  (T, bb, F) -> (T*bb, F) is a leading-axis merge.
    x2d = x_ref[...].reshape(T * bb, F)
    gi = jnp.dot(x2d, wih_ref[...], preferred_element_type=jnp.float32)
    gi = gi + bcomb_ref[...]
    gi_ref[...] = gi.reshape(T, bb, 3 * Hp)

    # ---- 2) Loop-invariant loads / broadcasts hoisted out of the recurrence.
    w_hh = whh_ref[...]                                   # (Hp, 3Hp) bf16, resident
    b_hn = jnp.broadcast_to(bhn_ref[...], (bb, Hp))       # (bb, Hp) f32

    # ---- 3) Serial recurrence over T.  h carried as (f32, bf16) so the MXU
    #         operand cast sits off the gate-math critical path.
    def step(t, carry):
        h_f32, h_bf16 = carry
        gi_t = gi_ref[t]                                  # (bb, 3Hp) dense load
        gh = jnp.dot(h_bf16, w_hh, preferred_element_type=jnp.float32)

        r = jax.nn.sigmoid(gi_t[:, 0:Hp] + gh[:, 0:Hp])
        z = jax.nn.sigmoid(gi_t[:, Hp:2 * Hp] + gh[:, Hp:2 * Hp])
        n = jnp.tanh(gi_t[:, 2 * Hp:] + r * (gh[:, 2 * Hp:] + b_hn))
        h_new = (1.0 - z) * n + z * h_f32

        out_ref[t] = jnp.maximum(h_new, 0.0).astype(out_ref.dtype)  # full-tile store
        return h_new, h_new.astype(jnp.bfloat16)

    h0 = jnp.zeros((bb, Hp), jnp.float32)                 # PyTorch default h_0 = 0
    jax.lax.fori_loop(0, T, step, (h0, h0.astype(jnp.bfloat16)), unroll=True)


def _pack_gru_params(w_ih, w_hh, b_ih, b_hh, Hp, compute_dtype=jnp.bfloat16):
    """PyTorch nn.GRU params (gate order r,z,n) -> fused, gate-padded kernel layout."""
    H = w_hh.shape[1]
    F = w_ih.shape[1]

    wi = w_ih.reshape(3, H, F)                            # (gate, out, in_feat)
    wh = w_hh.reshape(3, H, H)                            # (gate, out, in_hidden)
    bi = b_ih.reshape(3, H)
    bh = b_hh.reshape(3, H)

    wih_pad = jnp.zeros((3, Hp, F), w_ih.dtype).at[:, :H, :].set(wi)
    whh_pad = jnp.zeros((3, Hp, Hp), w_hh.dtype).at[:, :H, :H].set(wh)
    wih_cat = jnp.transpose(wih_pad, (2, 0, 1)).reshape(F, 3 * Hp).astype(compute_dtype)
    whh_cat = jnp.transpose(whh_pad, (2, 0, 1)).reshape(Hp, 3 * Hp).astype(compute_dtype)

    bcomb3 = jnp.concatenate([bi[:2] + bh[:2], bi[2:3]], axis=0)          # (3, H)
    bcomb = jnp.zeros((3, Hp), jnp.float32).at[:, :H].set(bcomb3).reshape(1, 3 * Hp)
    bhn = jnp.zeros((1, Hp), jnp.float32).at[:, :H].set(bh[2:3])
    return wih_cat, whh_cat, bcomb, bhn


def gru_multi_forward(x, w_ih, w_hh, b_ih, b_hh, *, batch_block=None,
                      compute_dtype=jnp.bfloat16):
    """relu(GRU(x)) for a single-layer batch_first nn.GRU.

    x: (B, T, F).  PyTorch-format params: w_ih (3H,F), w_hh (3H,H),
    b_ih (3H,), b_hh (3H,), gate order [r, z, n].  Returns (B, T, H) float32.
    """
    B, T, F = x.shape
    H = w_hh.shape[1]
    Hp = _round_up(max(H, 1), 128)                 # pad each gate block to 128 lanes

    if batch_block is None:
        batch_block = min(128, _round_up(B, 8))
    batch_block = _round_up(batch_block, 8)        # sublane multiple for f32 tiles
    B_pad = _round_up(B, batch_block)
    nb = B_pad // batch_block                      # v7x: >=2 blocks shard across TCs

    wih_cat, whh_cat, bcomb, bhn = _pack_gru_params(w_ih, w_hh, b_ih, b_hh, Hp,
                                                    compute_dtype)

    if B_pad != B:
        x = jnp.pad(x, ((0, B_pad - B), (0, 0), (0, 0)))
    x_tm = jnp.transpose(x, (1, 0, 2)).astype(compute_dtype)   # (T, B_pad, F)

    # VMEM budget derived from block sizes (double-buffered I/O + scratch), clamped.
    vmem_need = (2 * T * batch_block * F * 2             # x block (bf16)
                 + 2 * T * batch_block * Hp * 4          # out block (f32)
                 + 2 * (F + Hp) * 3 * Hp * 2             # weights (bf16)
                 + 2 * 4 * Hp * 4                        # biases (f32)
                 + T * batch_block * 3 * Hp * 4          # gi scratch (f32)
                 + 4 * batch_block * Hp * 4)             # h / gate temporaries slack
    vmem_limit = int(min(100 * 2**20, max(32 * 2**20, 2 * vmem_need)))

    out_tm = pl.pallas_call(
        gru_relu_kernel,
        out_shape=jax.ShapeDtypeStruct((T, B_pad, Hp), jnp.float32),
        grid_spec=pltpu.PrefetchScalarGridSpec(
            num_scalar_prefetch=0,
            grid=(nb,),                                             # batch blocks only
            in_specs=[
                pl.BlockSpec((T, batch_block, F), lambda i: (0, i, 0)),  # x, time-major
                pl.BlockSpec((F, 3 * Hp), lambda i: (0, 0)),             # W_ih (resident)
                pl.BlockSpec((Hp, 3 * Hp), lambda i: (0, 0)),            # W_hh (resident)
                pl.BlockSpec((1, 3 * Hp), lambda i: (0, 0)),             # fused biases
                pl.BlockSpec((1, Hp), lambda i: (0, 0)),                 # b_hn
            ],
            out_specs=pl.BlockSpec((T, batch_block, Hp), lambda i: (0, i, 0)),
            scratch_shapes=[pltpu.VMEM((T, batch_block, 3 * Hp), jnp.float32)],
        ),
        compiler_params=pltpu.CompilerParams(
            dimension_semantics=("parallel",),     # batch blocks shard across TCs (v7x)
            vmem_limit_bytes=vmem_limit,
        ),
    )(x_tm, wih_cat, whh_cat, bcomb, bhn)

    # time-major padded (T, B_pad, Hp) -> (B, T, H)
    return jnp.transpose(out_tm, (1, 0, 2))[:B, :, :H]


# ----------------------------- reference & params -----------------------------

def gru_relu_ref(x, w_ih, w_hh, b_ih, b_hh, compute_dtype=jnp.bfloat16):
    """Pure-JAX reference with the SAME dtype handling as the kernel
    (bf16 matmul operands, f32 accumulation / hidden state / gate math)."""
    B, T, F = x.shape
    H = w_hh.shape[1]

    wi = w_ih.T.astype(compute_dtype)            # (F, 3H), gate order r,z,n
    wh = w_hh.T.astype(compute_dtype)            # (H, 3H)
    b_comb = jnp.concatenate([b_ih[:2 * H] + b_hh[:2 * H], b_ih[2 * H:]])[None, :]
    b_hn = b_hh[2 * H:][None, :]

    gi = jnp.dot(x.astype(compute_dtype).reshape(B * T, F), wi,
                 preferred_element_type=jnp.float32).reshape(B, T, 3 * H) + b_comb

    def step(h, gi_t):                           # gi_t: (B, 3H)
        gh = jnp.dot(h.astype(compute_dtype), wh, preferred_element_type=jnp.float32)
        r = jax.nn.sigmoid(gi_t[:, 0:H] + gh[:, 0:H])
        z = jax.nn.sigmoid(gi_t[:, H:2 * H] + gh[:, H:2 * H])
        n = jnp.tanh(gi_t[:, 2 * H:] + r * (gh[:, 2 * H:] + b_hn))
        h_new = (1.0 - z) * n + z * h
        return h_new, jnp.maximum(h_new, 0.0)

    h0 = jnp.zeros((B, H), jnp.float32)
    _, outs = jax.lax.scan(step, h0, jnp.transpose(gi, (1, 0, 2)))
    return jnp.transpose(outs, (1, 0, 2))        # (B, T, H)


def init_gru_params(key, feature_size, embed_size):
    """PyTorch nn.GRU-shaped params: weight_ih_l0 (3H,F), weight_hh_l0 (3H,H),
    bias_ih_l0 (3H,), bias_hh_l0 (3H,), uniform(-1/sqrt(H), 1/sqrt(H)), order r,z,n."""
    H, F = embed_size, feature_size
    k = 1.0 / jnp.sqrt(jnp.float32(H))
    k1, k2, k3, k4 = jax.random.split(key, 4)
    w_ih = jax.random.uniform(k1, (3 * H, F), jnp.float32, -k, k)
    w_hh = jax.random.uniform(k2, (3 * H, H), jnp.float32, -k, k)
    b_ih = jax.random.uniform(k3, (3 * H,), jnp.float32, -k, k)
    b_hh = jax.random.uniform(k4, (3 * H,), jnp.float32, -k, k)
    return w_ih, w_hh, b_ih, b_hh


if __name__ == "__main__":
    B, T, F, H = 2, 8, 16, 32   # batch, seq, feature_size, embed_size

    key = jax.random.PRNGKey(0)
    kx, kp = jax.random.split(key)
    x = jax.random.normal(kx, (B, T, F), jnp.float32)
    w_ih, w_hh, b_ih, b_hh = init_gru_params(kp, F, H)

    out = jax.block_until_ready(gru_multi_forward(x, w_ih, w_hh, b_ih, b_hh))
    ref = jax.block_until_ready(gru_relu_ref(x, w_ih, w_hh, b_ih, b_hh))

    assert out.shape == (B, T, H)
    assert jnp.allclose(out, ref, atol=1e-4, rtol=1e-4), "mismatch vs reference"

    print("KERNEL_OK")
</pallas_src>

<mosaic_0001>
module attributes {stable_mosaic.version = 11 : i64} {
  func.func @gru_relu_kernel(%arg0: i32, %arg1: memref<8x8x16xbf16, #tpu.memory_space<vmem>>, %arg2: memref<16x384xbf16, #tpu.memory_space<vmem>>, %arg3: memref<128x384xbf16, #tpu.memory_space<vmem>>, %arg4: memref<1x384xf32, #tpu.memory_space<vmem>>, %arg5: memref<1x128xf32, #tpu.memory_space<vmem>>, %arg6: memref<8x8x128xf32, #tpu.memory_space<vmem>>, %arg7: memref<8x8x384xf32, #tpu.memory_space<vmem>>) attributes {dimension_semantics = [#tpu.dimension_semantics<parallel>], iteration_bounds = array<i64: 1>, scalar_prefetch = 0 : i64, scratch_operands = 1 : i64, tpu.core_type = #tpu.core_type<tc>, window_params = [{transform_indices = @transform_0, window_bounds = array<i64: 8, 8, 16>}, {pipeline_mode = #tpu.pipeline_mode<synchronous>, transform_indices = @transform_1, window_bounds = array<i64: 16, 384>}, {pipeline_mode = #tpu.pipeline_mode<synchronous>, transform_indices = @transform_2, window_bounds = array<i64: 128, 384>}, {pipeline_mode = #tpu.pipeline_mode<synchronous>, transform_indices = @transform_3, window_bounds = array<i64: 1, 384>}, {pipeline_mode = #tpu.pipeline_mode<synchronous>, transform_indices = @transform_4, window_bounds = array<i64: 1, 128>}, {transform_indices = @transform_5, window_bounds = array<i64: 8, 8, 128>}]} {
    %c0 = arith.constant 0 : index
    %c0_0 = arith.constant 0 : index
    %c0_1 = arith.constant 0 : index
    %0 = vector.load %arg1[%c0, %c0_0, %c0_1] : memref<8x8x16xbf16, #tpu.memory_space<vmem>>, vector<8x8x16xbf16>
    %1 = vector.shape_cast %0 : vector<8x8x16xbf16> to vector<64x16xbf16>
    %c0_2 = arith.constant 0 : index
    %c0_3 = arith.constant 0 : index
    %2 = vector.load %arg2[%c0_2, %c0_3] : memref<16x384xbf16, #tpu.memory_space<vmem>>, vector<16x384xbf16>
    %cst = arith.constant dense<0.000000e+00> : vector<64x384xf32>
    %3 = tpu.matmul %1, %2, %cst {dimension_numbers = #tpu.dot_dimension_numbers<[1], [0], [0], [1], [0, 0, 1, 1], [], []>} : vector<64x16xbf16>, vector<16x384xbf16>, vector<64x384xf32> -> vector<64x384xf32>
    %c0_4 = arith.constant 0 : index
    %c0_5 = arith.constant 0 : index
    %4 = vector.load %arg4[%c0_4, %c0_5] : memref<1x384xf32, #tpu.memory_space<vmem>>, vector<1x384xf32>
    %5 = vector.broadcast %4 : vector<1x384xf32> to vector<64x384xf32>
    %6 = arith.addf %3, %5 : vector<64x384xf32>
    %7 = vector.shape_cast %6 : vector<64x384xf32> to vector<8x8x384xf32>
    %c0_6 = arith.constant 0 : index
    %c0_7 = arith.constant 0 : index
    %c0_8 = arith.constant 0 : index
    %8 = vector.load %arg7[%c0_6, %c0_7, %c0_8] : memref<8x8x384xf32, #tpu.memory_space<vmem>>, vector<8x8x384xf32>
    tpu.vector_store %arg7[%c0_6, %c0_7, %c0_8], %7 {strides = array<i32>} : memref<8x8x384xf32, #tpu.memory_space<vmem>>, vector<8x8x384xf32>,
    %c0_9 = arith.constant 0 : index
    %c0_10 = arith.constant 0 : index
    %9 = vector.load %arg3[%c0_9, %c0_10] : memref<128x384xbf16, #tpu.memory_space<vmem>>, vector<128x384xbf16>
    %c0_11 = arith.constant 0 : index
    %c0_12 = arith.constant 0 : index
    %10 = vector.load %arg5[%c0_11, %c0_12] : memref<1x128xf32, #tpu.memory_space<vmem>>, vector<1x128xf32>
    %11 = vector.shape_cast %10 : vector<1x128xf32> to vector<1x128xf32>
    %12 = vector.broadcast %11 : vector<1x128xf32> to vector<8x128xf32>
    %cst_13 = arith.constant 0.000000e+00 : f32
    %13 = vector.broadcast %cst_13 : f32 to vector<8x128xf32>
    %14 = arith.truncf %13 : vector<8x128xf32> to vector<8x128xbf16>
    %c0_i32 = arith.constant 0 : i32
    %15 = arith.index_cast %c0_i32 : i32 to index
    %c0_14 = arith.constant 0 : index
    %c0_15 = arith.constant 0 : index
    %16 = vector.load %arg7[%15, %c0_14, %c0_15] : memref<8x8x384xf32, #tpu.memory_space<vmem>>, vector<1x8x384xf32>
    %17 = vector.shape_cast %16 : vector<1x8x384xf32> to vector<8x384xf32>
    %cst_16 = arith.constant dense<0.000000e+00> : vector<8x384xf32>
    %18 = tpu.matmul %14, %9, %cst_16 {dimension_numbers = #tpu.dot_dimension_numbers<[1], [0], [0], [1], [0, 0, 1, 1], [], []>} : vector<8x128xbf16>, vector<128x384xbf16>, vector<8x384xf32> -> vector<8x384xf32>
    %19 = vector.extract_strided_slice %17 {offsets = [0, 0], sizes = [8, 128], strides = [1, 1]} : vector<8x384xf32> to vector<8x128xf32>
    %20 = vector.extract_strided_slice %18 {offsets = [0, 0], sizes = [8, 128], strides = [1, 1]} : vector<8x384xf32> to vector<8x128xf32>
    %21 = arith.addf %19, %20 : vector<8x128xf32>
    %22 = arith.negf %21 : vector<8x128xf32>
    %23 = math.exp %22 : vector<8x128xf32>
    %cst_17 = arith.constant 1.000000e+00 : f32
    %24 = vector.broadcast %cst_17 : f32 to vector<8x128xf32>
    %25 = arith.addf %24, %23 : vector<8x128xf32>
    %26 = arith.divf %24, %25 : vector<8x128xf32>
    %27 = vector.extract_strided_slice %17 {offsets = [0, 128], sizes = [8, 128], strides = [1, 1]} : vector<8x384xf32> to vector<8x128xf32>
    %28 = vector.extract_strided_slice %18 {offsets = [0, 128], sizes = [8, 128], strides = [1, 1]} : vector<8x384xf32> to vector<8x128xf32>
    %29 = arith.addf %27, %28 : vector<8x128xf32>
    %30 = arith.negf %29 : vector<8x128xf32>
    %31 = math.exp %30 : vector<8x128xf32>
    %cst_18 = arith.constant 1.000000e+00 : f32
    %32 = vector.broadcast %cst_18 : f32 to vector<8x128xf32>
    %33 = arith.addf %32, %31 : vector<8x128xf32>
    %34 = arith.divf %32, %33 : vector<8x128xf32>
    %35 = vector.extract_strided_slice %17 {offsets = [0, 256], sizes = [8, 128], strides = [1, 1]} : vector<8x384xf32> to vector<8x128xf32>
    %36 = vector.extract_strided_slice %18 {offsets = [0, 256], sizes = [8, 128], strides = [1, 1]} : vector<8x384xf32> to vector<8x128xf32>
    %37 = arith.addf %36, %12 : vector<8x128xf32>
    %38 = arith.mulf %26, %37 : vector<8x128xf32>
    %39 = arith.addf %35, %38 : vector<8x128xf32>
    %40 = math.tanh %39 : vector<8x128xf32>
    %cst_19 = arith.constant 1.000000e+00 : f32
    %41 = vector.broadcast %cst_19 : f32 to vector<8x128xf32>
    %42 = arith.subf %41, %34 : vector<8x128xf32>
    %43 = arith.mulf %42, %40 : vector<8x128xf32>
    %44 = arith.mulf %34, %13 : vector<8x128xf32>
    %45 = arith.addf %43, %44 : vector<8x128xf32>
    %cst_20 = arith.constant 0.000000e+00 : f32
    %46 = vector.broadcast %cst_20 : f32 to vector<8x128xf32>
    %47 = arith.maximumf %45, %46 : vector<8x128xf32>
    %48 = arith.index_cast %c0_i32 : i32 to index
    %c0_21 = arith.constant 0 : index
    %c0_22 = arith.constant 0 : index
    %49 = vector.load %arg6[%48, %c0_21, %c0_22] : memref<8x8x128xf32, #tpu.memory_space<vmem>>, vector<1x8x128xf32>
    %50 = vector.shape_cast %49 : vector<1x8x128xf32> to vector<8x128xf32>
    %51 = vector.shape_cast %47 : vector<8x128xf32> to vector<1x8x128xf32>
    tpu.vector_store %arg6[%48, %c0_21, %c0_22], %51 {strides = array<i32>} : memref<8x8x128xf32, #tpu.memory_space<vmem>>, vector<1x8x128xf32>,
    %52 = arith.truncf %45 : vector<8x128xf32> to vector<8x128xbf16>
    %c1_i32 = arith.constant 1 : i32
    %53 = arith.index_cast %c1_i32 : i32 to index
    %c0_23 = arith.constant 0 : index
    %c0_24 = arith.constant 0 : index
    %54 = vector.load %arg7[%53, %c0_23, %c0_24] : memref<8x8x384xf32, #tpu.memory_space<vmem>>, vector<1x8x384xf32>
    %55 = vector.shape_cast %54 : vector<1x8x384xf32> to vector<8x384xf32>
    %cst_25 = arith.constant dense<0.000000e+00> : vector<8x384xf32>
    %56 = tpu.matmul %52, %9, %cst_25 {dimension_numbers = #tpu.dot_dimension_numbers<[1], [0], [0], [1], [0, 0, 1, 1], [], []>} : vector<8x128xbf16>, vector<128x384xbf16>, vector<8x384xf32> -> vector<8x384xf32>
    %57 = vector.extract_strided_slice %55 {offsets = [0, 0], sizes = [8, 128], strides = [1, 1]} : vector<8x384xf32> to vector<8x128xf32>
    %58 = vector.extract_strided_slice %56 {offsets = [0, 0], sizes = [8, 128], strides = [1, 1]} : vector<8x384xf32> to vector<8x128xf32>
    %59 = arith.addf %57, %58 : vector<8x128xf32>
    %60 = arith.negf %59 : vector<8x128xf32>
    %61 = math.exp %60 : vector<8x128xf32>
    %cst_26 = arith.constant 1.000000e+00 : f32
    %62 = vector.broadcast %cst_26 : f32 to vector<8x128xf32>
    %63 = arith.addf %62, %61 : vector<8x128xf32>
    %64 = arith.divf %62, %63 : vector<8x128xf32>
    %65 = vector.extract_strided_slice %55 {offsets = [0, 128], sizes = [8, 128], strides = [1, 1]} : vector<8x384xf32> to vector<8x128xf32>
    %66 = vector.extract_strided_slice %56 {offsets = [0, 128], sizes = [8, 128], strides = [1, 1]} : vector<8x384xf32> to vector<8x128xf32>
    %67 = arith.addf %65, %66 : vector<8x128xf32>
    %68 = arith.negf %67 : vector<8x128xf32>
    %69 = math.exp %68 : vector<8x128xf32>
    %cst_27 = arith.constant 1.000000e+00 : f32
    %70 = vector.broadcast %cst_27 : f32 to vector<8x128xf32>
    %71 = arith.addf %70, %69 : vector<8x128xf32>
    %72 = arith.divf %70, %71 : vector<8x128xf32>
    %73 = vector.extract_strided_slice %55 {offsets = [0, 256], sizes = [8, 128], strides = [1, 1]} : vector<8x384xf32> to vector<8x128xf32>
    %74 = vector.extract_strided_slice %56 {offsets = [0, 256], sizes = [8, 128], strides = [1, 1]} : vector<8x384xf32> to vector<8x128xf32>
    %75 = arith.addf %74, %12 : vector<8x128xf32>
    %76 = arith.mulf %64, %75 : vector<8x128xf32>
    %77 = arith.addf %73, %76 : vector<8x128xf32>
    %78 = math.tanh %77 : vector<8x128xf32>
    %cst_28 = arith.constant 1.000000e+00 : f32
    %79 = vector.broadcast %cst_28 : f32 to vector<8x128xf32>
    %80 = arith.subf %79, %72 : vector<8x128xf32>
    %81 = arith.mulf %80, %78 : vector<8x128xf32>
    %82 = arith.mulf %72, %45 : vector<8x128xf32>
    %83 = arith.addf %81, %82 : vector<8x128xf32>
    %cst_29 = arith.constant 0.000000e+00 : f32
    %84 = vector.broadcast %cst_29 : f32 to vector<8x128xf32>
    %85 = arith.maximumf %83, %84 : vector<8x128xf32>
    %86 = arith.index_cast %c1_i32 : i32 to index
    %c0_30 = arith.constant 0 : index
    %c0_31 = arith.constant 0 : index
    %87 = vector.load %arg6[%86, %c0_30, %c0_31] : memref<8x8x128xf32, #tpu.memory_space<vmem>>, vector<1x8x128xf32>
    %88 = vector.shape_cast %87 : vector<1x8x128xf32> to vector<8x128xf32>
    %89 = vector.shape_cast %85 : vector<8x128xf32> to vector<1x8x128xf32>
    tpu.vector_store %arg6[%86, %c0_30, %c0_31], %89 {strides = array<i32>} : memref<8x8x128xf32, #tpu.memory_space<vmem>>, vector<1x8x128xf32>,
    %90 = arith.truncf %83 : vector<8x128xf32> to vector<8x128xbf16>
    %c2_i32 = arith.constant 2 : i32
    %91 = arith.index_cast %c2_i32 : i32 to index
    %c0_32 = arith.constant 0 : index
    %c0_33 = arith.constant 0 : index
    %92 = vector.load %arg7[%91, %c0_32, %c0_33] : memref<8x8x384xf32, #tpu.memory_space<vmem>>, vector<1x8x384xf32>
    %93 = vector.shape_cast %92 : vector<1x8x384xf32> to vector<8x384xf32>
    %cst_34 = arith.constant dense<0.000000e+00> : vector<8x384xf32>
    %94 = tpu.matmul %90, %9, %cst_34 {dimension_numbers = #tpu.dot_dimension_numbers<[1], [0], [0], [1], [0, 0, 1, 1], [], []>} : vector<8x128xbf16>, vector<128x384xbf16>, vector<8x384xf32> -> vector<8x384xf32>
    %95 = vector.extract_strided_slice %93 {offsets = [0, 0], sizes = [8, 128], strides = [1, 1]} : vector<8x384xf32> to vector<8x128xf32>
    %96 = vector.extract_strided_slice %94 {offsets = [0, 0], sizes = [8, 128], strides = [1, 1]} : vector<8x384xf32> to vector<8x128xf32>
    %97 = arith.addf %95, %96 : vector<8x128xf32>
    %98 = arith.negf %97 : vector<8x128xf32>
    %99 = math.exp %98 : vector<8x128xf32>
    %cst_35 = arith.constant 1.000000e+00 : f32
    %100 = vector.broadcast %cst_35 : f32 to vector<8x128xf32>
    %101 = arith.addf %100, %99 : vector<8x128xf32>
    %102 = arith.divf %100, %101 : vector<8x128xf32>
    %103 = vector.extract_strided_slice %93 {offsets = [0, 128], sizes = [8, 128], strides = [1, 1]} : vector<8x384xf32> to vector<8x128xf32>
    %104 = vector.extract_strided_slice %94 {offsets = [0, 128], sizes = [8, 128], strides = [1, 1]} : vector<8x384xf32> to vector<8x128xf32>
    %105 = arith.addf %103, %104 : vector<8x128xf32>
    %106 = arith.negf %105 : vector<8x128xf32>
    %107 = math.exp %106 : vector<8x128xf32>
    %cst_36 = arith.constant 1.000000e+00 : f32
    %108 = vector.broadcast %cst_36 : f32 to vector<8x128xf32>
    %109 = arith.addf %108, %107 : vector<8x128xf32>
    %110 = arith.divf %108, %109 : vector<8x128xf32>
    %111 = vector.extract_strided_slice %93 {offsets = [0, 256], sizes = [8, 128], strides = [1, 1]} : vector<8x384xf32> to vector<8x128xf32>
    %112 = vector.extract_strided_slice %94 {offsets = [0, 256], sizes = [8, 128], strides = [1, 1]} : vector<8x384xf32> to vector<8x128xf32>
    %113 = arith.addf %112, %12 : vector<8x128xf32>
    %114 = arith.mulf %102, %113 : vector<8x128xf32>
    %115 = arith.addf %111, %114 : vector<8x128xf32>
    %116 = math.tanh %115 : vector<8x128xf32>
    %cst_37 = arith.constant 1.000000e+00 : f32
    %117 = vector.broadcast %cst_37 : f32 to vector<8x128xf32>
    %118 = arith.subf %117, %110 : vector<8x128xf32>
    %119 = arith.mulf %118, %116 : vector<8x128xf32>
    %120 = arith.mulf %110, %83 : vector<8x128xf32>
    %121 = arith.addf %119, %120 : vector<8x128xf32>
    %cst_38 = arith.constant 0.000000e+00 : f32
    %122 = vector.broadcast %cst_38 : f32 to vector<8x128xf32>
    %123 = arith.maximumf %121, %122 : vector<8x128xf32>
    %124 = arith.index_cast %c2_i32 : i32 to index
    %c0_39 = arith.constant 0 : index
    %c0_40 = arith.constant 0 : index
    %125 = vector.load %arg6[%124, %c0_39, %c0_40] : memref<8x8x128xf32, #tpu.memory_space<vmem>>, vector<1x8x128xf32>
    %126 = vector.shape_cast %125 : vector<1x8x128xf32> to vector<8x128xf32>
    %127 = vector.shape_cast %123 : vector<8x128xf32> to vector<1x8x128xf32>
    tpu.vector_store %arg6[%124, %c0_39, %c0_40], %127 {strides = array<i32>} : memref<8x8x128xf32, #tpu.memory_space<vmem>>, vector<1x8x128xf32>,
    %128 = arith.truncf %121 : vector<8x128xf32> to vector<8x128xbf16>
    %c3_i32 = arith.constant 3 : i32
    %129 = arith.index_cast %c3_i32 : i32 to index
    %c0_41 = arith.constant 0 : index
    %c0_42 = arith.constant 0 : index
    %130 = vector.load %arg7[%129, %c0_41, %c0_42] : memref<8x8x384xf32, #tpu.memory_space<vmem>>, vector<1x8x384xf32>
    %131 = vector.shape_cast %130 : vector<1x8x384xf32> to vector<8x384xf32>
    %cst_43 = arith.constant dense<0.000000e+00> : vector<8x384xf32>
    %132 = tpu.matmul %128, %9, %cst_43 {dimension_numbers = #tpu.dot_dimension_numbers<[1], [0], [0], [1], [0, 0, 1, 1], [], []>} : vector<8x128xbf16>, vector<128x384xbf16>, vector<8x384xf32> -> vector<8x384xf32>
    %133 = vector.extract_strided_slice %131 {offsets = [0, 0], sizes = [8, 128], strides = [1, 1]} : vector<8x384xf32> to vector<8x128xf32>
    %134 = vector.extract_strided_slice %132 {offsets = [0, 0], sizes = [8, 128], strides = [1, 1]} : vector<8x384xf32> to vector<8x128xf32>
    %135 = arith.addf %133, %134 : vector<8x128xf32>
    %136 = arith.negf %135 : vector<8x128xf32>
    %137 = math.exp %136 : vector<8x128xf32>
    %cst_44 = arith.constant 1.000000e+00 : f32
    %138 = vector.broadcast %cst_44 : f32 to vector<8x128xf32>
    %139 = arith.addf %138, %137 : vector<8x128xf32>
    %140 = arith.divf %138, %139 : vector<8x128xf32>
    %141 = vector.extract_strided_slice %131 {offsets = [0, 128], sizes = [8, 128], strides = [1, 1]} : vector<8x384xf32> to vector<8x128xf32>
    %142 = vector.extract_strided_slice %132 {offsets = [0, 128], sizes = [8, 128], strides = [1, 1]} : vector<8x384xf32> to vector<8x128xf32>
    %143 = arith.addf %141, %142 : vector<8x128xf32>
    %144 = arith.negf %143 : vector<8x128xf32>
    %145 = math.exp %144 : vector<8x128xf32>
    %cst_45 = arith.constant 1.000000e+00 : f32
    %146 = vector.broadcast %cst_45 : f32 to vector<8x128xf32>
    %147 = arith.addf %146, %145 : vector<8x128xf32>
    %148 = arith.divf %146, %147 : vector<8x128xf32>
    %149 = vector.extract_strided_slice %131 {offsets = [0, 256], sizes = [8, 128], strides = [1, 1]} : vector<8x384xf32> to vector<8x128xf32>
    %150 = vector.extract_strided_slice %132 {offsets = [0, 256], sizes = [8, 128], strides = [1, 1]} : vector<8x384xf32> to vector<8x128xf32>
    %151 = arith.addf %150, %12 : vector<8x128xf32>
    %152 = arith.mulf %140, %151 : vector<8x128xf32>
    %153 = arith.addf %149, %152 : vector<8x128xf32>
    %154 = math.tanh %153 : vector<8x128xf32>
    %cst_46 = arith.constant 1.000000e+00 : f32
    %155 = vector.broadcast %cst_46 : f32 to vector<8x128xf32>
    %156 = arith.subf %155, %148 : vector<8x128xf32>
    %157 = arith.mulf %156, %154 : vector<8x128xf32>
    %158 = arith.mulf %148, %121 : vector<8x128xf32>
    %159 = arith.addf %157, %158 : vector<8x128xf32>
    %cst_47 = arith.constant 0.000000e+00 : f32
    %160 = vector.broadcast %cst_47 : f32 to vector<8x128xf32>
    %161 = arith.maximumf %159, %160 : vector<8x128xf32>
    %162 = arith.index_cast %c3_i32 : i32 to index
    %c0_48 = arith.constant 0 : index
    %c0_49 = arith.constant 0 : index
    %163 = vector.load %arg6[%162, %c0_48, %c0_49] : memref<8x8x128xf32, #tpu.memory_space<vmem>>, vector<1x8x128xf32>
    %164 = vector.shape_cast %163 : vector<1x8x128xf32> to vector<8x128xf32>
    %165 = vector.shape_cast %161 : vector<8x128xf32> to vector<1x8x128xf32>
    tpu.vector_store %arg6[%162, %c0_48, %c0_49], %165 {strides = array<i32>} : memref<8x8x128xf32, #tpu.memory_space<vmem>>, vector<1x8x128xf32>,
    %166 = arith.truncf %159 : vector<8x128xf32> to vector<8x128xbf16>
    %c4_i32 = arith.constant 4 : i32
    %167 = arith.index_cast %c4_i32 : i32 to index
    %c0_50 = arith.constant 0 : index
    %c0_51 = arith.constant 0 : index
    %168 = vector.load %arg7[%167, %c0_50, %c0_51] : memref<8x8x384xf32, #tpu.memory_space<vmem>>, vector<1x8x384xf32>
    %169 = vector.shape_cast %168 : vector<1x8x384xf32> to vector<8x384xf32>
    %cst_52 = arith.constant dense<0.000000e+00> : vector<8x384xf32>
    %170 = tpu.matmul %166, %9, %cst_52 {dimension_numbers = #tpu.dot_dimension_numbers<[1], [0], [0], [1], [0, 0, 1, 1], [], []>} : vector<8x128xbf16>, vector<128x384xbf16>, vector<8x384xf32> -> vector<8x384xf32>
    %171 = vector.extract_strided_slice %169 {offsets = [0, 0], sizes = [8, 128], strides = [1, 1]} : vector<8x384xf32> to vector<8x128xf32>
    %172 = vector.extract_strided_slice %170 {offsets = [0, 0], sizes = [8, 128], strides = [1, 1]} : vector<8x384xf32> to vector<8x128xf32>
    %173 = arith.addf %171, %172 : vector<8x128xf32>
    %174 = arith.negf %173 : vector<8x128xf32>
    %175 = math.exp %174 : vector<8x128xf32>
    %cst_53 = arith.constant 1.000000e+00 : f32
    %176 = vector.broadcast %cst_53 : f32 to vector<8x128xf32>
    %177 = arith.addf %176, %175 : vector<8x128xf32>
    %178 = arith.divf %176, %177 : vector<8x128xf32>
    %179 = vector.extract_strided_slice %169 {offsets = [0, 128], sizes = [8, 128], strides = [1, 1]} : vector<8x384xf32> to vector<8x128xf32>
    %180 = vector.extract_strided_slice %170 {offsets = [0, 128], sizes = [8, 128], strides = [1, 1]} : vector<8x384xf32> to vector<8x128xf32>
    %181 = arith.addf %179, %180 : vector<8x128xf32>
    %182 = arith.negf %181 : vector<8x128xf32>
    %183 = math.exp %182 : vector<8x128xf32>
    %cst_54 = arith.constant 1.000000e+00 : f32
    %184 = vector.broadcast %cst_54 : f32 to vector<8x128xf32>
    %185 = arith.addf %184, %183 : vector<8x128xf32>
    %186 = arith.divf %184, %185 : vector<8x128xf32>
    %187 = vector.extract_strided_slice %169 {offsets = [0, 256], sizes = [8, 128], strides = [1, 1]} : vector<8x384xf32> to vector<8x128xf32>
    %188 = vector.extract_strided_slice %170 {offsets = [0, 256], sizes = [8, 128], strides = [1, 1]} : vector<8x384xf32> to vector<8x128xf32>
    %189 = arith.addf %188, %12 : vector<8x128xf32>
    %190 = arith.mulf %178, %189 : vector<8x128xf32>
    %191 = arith.addf %187, %190 : vector<8x128xf32>
    %192 = math.tanh %191 : vector<8x128xf32>
    %cst_55 = arith.constant 1.000000e+00 : f32
    %193 = vector.broadcast %cst_55 : f32 to vector<8x128xf32>
    %194 = arith.subf %193, %186 : vector<8x128xf32>
    %195 = arith.mulf %194, %192 : vector<8x128xf32>
    %196 = arith.mulf %186, %159 : vector<8x128xf32>
    %197 = arith.addf %195, %196 : vector<8x128xf32>
    %cst_56 = arith.constant 0.000000e+00 : f32
    %198 = vector.broadcast %cst_56 : f32 to vector<8x128xf32>
    %199 = arith.maximumf %197, %198 : vector<8x128xf32>
    %200 = arith.index_cast %c4_i32 : i32 to index
    %c0_57 = arith.constant 0 : index
    %c0_58 = arith.constant 0 : index
    %201 = vector.load %arg6[%200, %c0_57, %c0_58] : memref<8x8x128xf32, #tpu.memory_space<vmem>>, vector<1x8x128xf32>
    %202 = vector.shape_cast %201 : vector<1x8x128xf32> to vector<8x128xf32>
    %203 = vector.shape_cast %199 : vector<8x128xf32> to vector<1x8x128xf32>
    tpu.vector_store %arg6[%200, %c0_57, %c0_58], %203 {strides = array<i32>} : memref<8x8x128xf32, #tpu.memory_space<vmem>>, vector<1x8x128xf32>,
    %204 = arith.truncf %197 : vector<8x128xf32> to vector<8x128xbf16>
    %c5_i32 = arith.constant 5 : i32
    %205 = arith.index_cast %c5_i32 : i32 to index
    %c0_59 = arith.constant 0 : index
    %c0_60 = arith.constant 0 : index
    %206 = vector.load %arg7[%205, %c0_59, %c0_60] : memref<8x8x384xf32, #tpu.memory_space<vmem>>, vector<1x8x384xf32>
    %207 = vector.shape_cast %206 : vector<1x8x384xf32> to vector<8x384xf32>
    %cst_61 = arith.constant dense<0.000000e+00> : vector<8x384xf32>
    %208 = tpu.matmul %204, %9, %cst_61 {dimension_numbers = #tpu.dot_dimension_numbers<[1], [0], [0], [1], [0, 0, 1, 1], [], []>} : vector<8x128xbf16>, vector<128x384xbf16>, vector<8x384xf32> -> vector<8x384xf32>
    %209 = vector.extract_strided_slice %207 {offsets = [0, 0], sizes = [8, 128], strides = [1, 1]} : vector<8x384xf32> to vector<8x128xf32>
    %210 = vector.extract_strided_slice %208 {offsets = [0, 0], sizes = [8, 128], strides = [1, 1]} : vector<8x384xf32> to vector<8x128xf32>
    %211 = arith.addf %209, %210 : vector<8x128xf32>
    %212 = arith.negf %211 : vector<8x128xf32>
    %213 = math.exp %212 : vector<8x128xf32>
    %cst_62 = arith.constant 1.000000e+00 : f32
    %214 = vector.broadcast %cst_62 : f32 to vector<8x128xf32>
    %215 = arith.addf %214, %213 : vector<8x128xf32>
    %216 = arith.divf %214, %215 : vector<8x128xf32>
    %217 = vector.extract_strided_slice %207 {offsets = [0, 128], sizes = [8, 128], strides = [1, 1]} : vector<8x384xf32> to vector<8x128xf32>
    %218 = vector.extract_strided_slice %208 {offsets = [0, 128], sizes = [8, 128], strides = [1, 1]} : vector<8x384xf32> to vector<8x128xf32>
    %219 = arith.addf %217, %218 : vector<8x128xf32>
    %220 = arith.negf %219 : vector<8x128xf32>
    %221 = math.exp %220 : vector<8x128xf32>
    %cst_63 = arith.constant 1.000000e+00 : f32
    %222 = vector.broadcast %cst_63 : f32 to vector<8x128xf32>
    %223 = arith.addf %222, %221 : vector<8x128xf32>
    %224 = arith.divf %222, %223 : vector<8x128xf32>
    %225 = vector.extract_strided_slice %207 {offsets = [0, 256], sizes = [8, 128], strides = [1, 1]} : vector<8x384xf32> to vector<8x128xf32>
    %226 = vector.extract_strided_slice %208 {offsets = [0, 256], sizes = [8, 128], strides = [1, 1]} : vector<8x384xf32> to vector<8x128xf32>
    %227 = arith.addf %226, %12 : vector<8x128xf32>
    %228 = arith.mulf %216, %227 : vector<8x128xf32>
    %229 = arith.addf %225, %228 : vector<8x128xf32>
    %230 = math.tanh %229 : vector<8x128xf32>
    %cst_64 = arith.constant 1.000000e+00 : f32
    %231 = vector.broadcast %cst_64 : f32 to vector<8x128xf32>
    %232 = arith.subf %231, %224 : vector<8x128xf32>
    %233 = arith.mulf %232, %230 : vector<8x128xf32>
    %234 = arith.mulf %224, %197 : vector<8x128xf32>
    %235 = arith.addf %233, %234 : vector<8x128xf32>
    %cst_65 = arith.constant 0.000000e+00 : f32
    %236 = vector.broadcast %cst_65 : f32 to vector<8x128xf32>
    %237 = arith.maximumf %235, %236 : vector<8x128xf32>
    %238 = arith.index_cast %c5_i32 : i32 to index
    %c0_66 = arith.constant 0 : index
    %c0_67 = arith.constant 0 : index
    %239 = vector.load %arg6[%238, %c0_66, %c0_67] : memref<8x8x128xf32, #tpu.memory_space<vmem>>, vector<1x8x128xf32>
    %240 = vector.shape_cast %239 : vector<1x8x128xf32> to vector<8x128xf32>
    %241 = vector.shape_cast %237 : vector<8x128xf32> to vector<1x8x128xf32>
    tpu.vector_store %arg6[%238, %c0_66, %c0_67], %241 {strides = array<i32>} : memref<8x8x128xf32, #tpu.memory_space<vmem>>, vector<1x8x128xf32>,
    %242 = arith.truncf %235 : vector<8x128xf32> to vector<8x128xbf16>
    %c6_i32 = arith.constant 6 : i32
    %243 = arith.index_cast %c6_i32 : i32 to index
    %c0_68 = arith.constant 0 : index
    %c0_69 = arith.constant 0 : index
    %244 = vector.load %arg7[%243, %c0_68, %c0_69] : memref<8x8x384xf32, #tpu.memory_space<vmem>>, vector<1x8x384xf32>
    %245 = vector.shape_cast %244 : vector<1x8x384xf32> to vector<8x384xf32>
    %cst_70 = arith.constant dense<0.000000e+00> : vector<8x384xf32>
    %246 = tpu.matmul %242, %9, %cst_70 {dimension_numbers = #tpu.dot_dimension_numbers<[1], [0], [0], [1], [0, 0, 1, 1], [], []>} : vector<8x128xbf16>, vector<128x384xbf16>, vector<8x384xf32> -> vector<8x384xf32>
    %247 = vector.extract_strided_slice %245 {offsets = [0, 0], sizes = [8, 128], strides = [1, 1]} : vector<8x384xf32> to vector<8x128xf32>
    %248 = vector.extract_strided_slice %246 {offsets = [0, 0], sizes = [8, 128], strides = [1, 1]} : vector<8x384xf32> to vector<8x128xf32>
    %249 = arith.addf %247, %248 : vector<8x128xf32>
    %250 = arith.negf %249 : vector<8x128xf32>
    %251 = math.exp %250 : vector<8x128xf32>
    %cst_71 = arith.constant 1.000000e+00 : f32
    %252 = vector.broadcast %cst_71 : f32 to vector<8x128xf32>
    %253 = arith.addf %252, %251 : vector<8x128xf32>
    %254 = arith.divf %252, %253 : vector<8x128xf32>
    %255 = vector.extract_strided_slice %245 {offsets = [0, 128], sizes = [8, 128], strides = [1, 1]} : vector<8x384xf32> to vector<8x128xf32>
    %256 = vector.extract_strided_slice %246 {offsets = [0, 128], sizes = [8, 128], strides = [1, 1]} : vector<8x384xf32> to vector<8x128xf32>
    %257 = arith.addf %255, %256 : vector<8x128xf32>
    %258 = arith.negf %257 : vector<8x128xf32>
    %259 = math.exp %258 : vector<8x128xf32>
    %cst_72 = arith.constant 1.000000e+00 : f32
    %260 = vector.broadcast %cst_72 : f32 to vector<8x128xf32>
    %261 = arith.addf %260, %259 : vector<8x128xf32>
    %262 = arith.divf %260, %261 : vector<8x128xf32>
    %263 = vector.extract_strided_slice %245 {offsets = [0, 256], sizes = [8, 128], strides = [1, 1]} : vector<8x384xf32> to vector<8x128xf32>
    %264 = vector.extract_strided_slice %246 {offsets = [0, 256], sizes = [8, 128], strides = [1, 1]} : vector<8x384xf32> to vector<8x128xf32>
    %265 = arith.addf %264, %12 : vector<8x128xf32>
    %266 = arith.mulf %254, %265 : vector<8x128xf32>
    %267 = arith.addf %263, %266 : vector<8x128xf32>
    %268 = math.tanh %267 : vector<8x128xf32>
    %cst_73 = arith.constant 1.000000e+00 : f32
    %269 = vector.broadcast %cst_73 : f32 to vector<8x128xf32>
    %270 = arith.subf %269, %262 : vector<8x128xf32>
    %271 = arith.mulf %270, %268 : vector<8x128xf32>
    %272 = arith.mulf %262, %235 : vector<8x128xf32>
    %273 = arith.addf %271, %272 : vector<8x128xf32>
    %cst_74 = arith.constant 0.000000e+00 : f32
    %274 = vector.broadcast %cst_74 : f32 to vector<8x128xf32>
    %275 = arith.maximumf %273, %274 : vector<8x128xf32>
    %276 = arith.index_cast %c6_i32 : i32 to index
    %c0_75 = arith.constant 0 : index
    %c0_76 = arith.constant 0 : index
    %277 = vector.load %arg6[%276, %c0_75, %c0_76] : memref<8x8x128xf32, #tpu.memory_space<vmem>>, vector<1x8x128xf32>
    %278 = vector.shape_cast %277 : vector<1x8x128xf32> to vector<8x128xf32>
    %279 = vector.shape_cast %275 : vector<8x128xf32> to vector<1x8x128xf32>
    tpu.vector_store %arg6[%276, %c0_75, %c0_76], %279 {strides = array<i32>} : memref<8x8x128xf32, #tpu.memory_space<vmem>>, vector<1x8x128xf32>,
    %280 = arith.truncf %273 : vector<8x128xf32> to vector<8x128xbf16>
    %c7_i32 = arith.constant 7 : i32
    %281 = arith.index_cast %c7_i32 : i32 to index
    %c0_77 = arith.constant 0 : index
    %c0_78 = arith.constant 0 : index
    %282 = vector.load %arg7[%281, %c0_77, %c0_78] : memref<8x8x384xf32, #tpu.memory_space<vmem>>, vector<1x8x384xf32>
    %283 = vector.shape_cast %282 : vector<1x8x384xf32> to vector<8x384xf32>
    %cst_79 = arith.constant dense<0.000000e+00> : vector<8x384xf32>
    %284 = tpu.matmul %280, %9, %cst_79 {dimension_numbers = #tpu.dot_dimension_numbers<[1], [0], [0], [1], [0, 0, 1, 1], [], []>} : vector<8x128xbf16>, vector<128x384xbf16>, vector<8x384xf32> -> vector<8x384xf32>
    %285 = vector.extract_strided_slice %283 {offsets = [0, 0], sizes = [8, 128], strides = [1, 1]} : vector<8x384xf32> to vector<8x128xf32>
    %286 = vector.extract_strided_slice %284 {offsets = [0, 0], sizes = [8, 128], strides = [1, 1]} : vector<8x384xf32> to vector<8x128xf32>
    %287 = arith.addf %285, %286 : vector<8x128xf32>
    %288 = arith.negf %287 : vector<8x128xf32>
    %289 = math.exp %288 : vector<8x128xf32>
    %cst_80 = arith.constant 1.000000e+00 : f32
    %290 = vector.broadcast %cst_80 : f32 to vector<8x128xf32>
    %291 = arith.addf %290, %289 : vector<8x128xf32>
    %292 = arith.divf %290, %291 : vector<8x128xf32>
    %293 = vector.extract_strided_slice %283 {offsets = [0, 128], sizes = [8, 128], strides = [1, 1]} : vector<8x384xf32> to vector<8x128xf32>
    %294 = vector.extract_strided_slice %284 {offsets = [0, 128], sizes = [8, 128], strides = [1, 1]} : vector<8x384xf32> to vector<8x128xf32>
    %295 = arith.addf %293, %294 : vector<8x128xf32>
    %296 = arith.negf %295 : vector<8x128xf32>
    %297 = math.exp %296 : vector<8x128xf32>
    %cst_81 = arith.constant 1.000000e+00 : f32
    %298 = vector.broadcast %cst_81 : f32 to vector<8x128xf32>
    %299 = arith.addf %298, %297 : vector<8x128xf32>
    %300 = arith.divf %298, %299 : vector<8x128xf32>
    %301 = vector.extract_strided_slice %283 {offsets = [0, 256], sizes = [8, 128], strides = [1, 1]} : vector<8x384xf32> to vector<8x128xf32>
    %302 = vector.extract_strided_slice %284 {offsets = [0, 256], sizes = [8, 128], strides = [1, 1]} : vector<8x384xf32> to vector<8x128xf32>
    %303 = arith.addf %302, %12 : vector<8x128xf32>
    %304 = arith.mulf %292, %303 : vector<8x128xf32>
    %305 = arith.addf %301, %304 : vector<8x128xf32>
    %306 = math.tanh %305 : vector<8x128xf32>
    %cst_82 = arith.constant 1.000000e+00 : f32
    %307 = vector.broadcast %cst_82 : f32 to vector<8x128xf32>
    %308 = arith.subf %307, %300 : vector<8x128xf32>
    %309 = arith.mulf %308, %306 : vector<8x128xf32>
    %310 = arith.mulf %300, %273 : vector<8x128xf32>
    %311 = arith.addf %309, %310 : vector<8x128xf32>
    %cst_83 = arith.constant 0.000000e+00 : f32
    %312 = vector.broadcast %cst_83 : f32 to vector<8x128xf32>
    %313 = arith.maximumf %311, %312 : vector<8x128xf32>
    %314 = arith.index_cast %c7_i32 : i32 to index
    %c0_84 = arith.constant 0 : index
    %c0_85 = arith.constant 0 : index
    %315 = vector.load %arg6[%314, %c0_84, %c0_85] : memref<8x8x128xf32, #tpu.memory_space<vmem>>, vector<1x8x128xf32>
    %316 = vector.shape_cast %315 : vector<1x8x128xf32> to vector<8x128xf32>
    %317 = vector.shape_cast %313 : vector<8x128xf32> to vector<1x8x128xf32>
    tpu.vector_store %arg6[%314, %c0_84, %c0_85], %317 {strides = array<i32>} : memref<8x8x128xf32, #tpu.memory_space<vmem>>, vector<1x8x128xf32>,
    %318 = arith.truncf %311 : vector<8x128xf32> to vector<8x128xbf16>
    %c8_i32 = arith.constant 8 : i32
    return
  }
  func.func @transform_0(%arg0: i32) -> (i32, i32, i32) {
    %c0_i32 = arith.constant 0 : i32
    %c0_i32_0 = arith.constant 0 : i32
    %c0_i32_1 = arith.constant 0 : i32
    return %c0_i32, %arg0, %c0_i32_0 : i32, i32, i32
  }
  func.func @transform_1(%arg0: i32) -> (i32, i32) {
    %c0_i32 = arith.constant 0 : i32
    %c0_i32_0 = arith.constant 0 : i32
    %c0_i32_1 = arith.constant 0 : i32
    return %c0_i32, %c0_i32_0 : i32, i32
  }
  func.func @transform_2(%arg0: i32) -> (i32, i32) {
    %c0_i32 = arith.constant 0 : i32
    %c0_i32_0 = arith.constant 0 : i32
    %c0_i32_1 = arith.constant 0 : i32
    return %c0_i32, %c0_i32_0 : i32, i32
  }
  func.func @transform_3(%arg0: i32) -> (i32, i32) {
    %c0_i32 = arith.constant 0 : i32
    %c0_i32_0 = arith.constant 0 : i32
    %c0_i32_1 = arith.constant 0 : i32
    return %c0_i32, %c0_i32_0 : i32, i32
  }
  func.func @transform_4(%arg0: i32) -> (i32, i32) {
    %c0_i32 = arith.constant 0 : i32
    %c0_i32_0 = arith.constant 0 : i32
    %c0_i32_1 = arith.constant 0 : i32
    return %c0_i32, %c0_i32_0 : i32, i32
  }
  func.func @transform_5(%arg0: i32) -> (i32, i32, i32) {
    %c0_i32 = arith.constant 0 : i32
    %c0_i32_0 = arith.constant 0 : i32
    %c0_i32_1 = arith.constant 0 : i32
    return %c0_i32, %arg0, %c0_i32_0 : i32, i32, i32
  }
}

</mosaic_0001>

<bundles_post_ra>
// kernel: tpu_custom_call.1
= control target key start
LH: loop header
LB: loop body
LE: loop exit
PB: predicated region body
PF: predicated region fallthrough
CT: control target
= control target key end

     0   :  { %10 = vsyncpa [#allocation4], 0  ;;  %s2482_s0 = inlined_call_operand.hbm [shape: bf16[8,8,16], index: 0, kind: input, shape index: {}]   ;;  %s2483_s1 = inlined_call_operand.hbm [shape: bf16[16,384], index: 1, kind: input, shape index: {}]   ;;  %s2484_s2 = inlined_call_operand.hbm [shape: bf16[128,384], index: 2, kind: input, shape index: {}]   ;;  %s2485_s3 = inlined_call_operand.vmem [shape: f32[1,384], index: 3, kind: input, shape index: {}]   ;;  %s2486_s4 = inlined_call_operand.vmem [shape: f32[1,128], index: 4, kind: input, shape index: {}]   ;;  %s2487_s5 = inlined_call_operand.hbm [shape: f32[8,8,128], index: 5, kind: output, shape index: {}]  }
   0x1   :  { %11 = vsyncpa [#allocation7], 0 }
   0x2   :  { %12 = vsyncpa [#allocation5], 0  ;;  %s1926_s18 = smov [#allocation6]   ;;  %s1832_s22 = scalar_lea.hbm %s2483_s1, 384 }
   0x3   :  { %s30_s19 = sshll.u32 %s1926_s18, 4  ;;  %p1833_p0 = scmp.ne.s32.totalorder %s2483_s1, %s1832_s22  ;;  %s31_s19 = int_to_ptr.vmem [resolvable:$true] %s30_s19 }
   0x4   :  { %p1836_p1 = scmp.lt.u32.totalorder %s1832_s22, %s2483_s1 }
   0x6   :  { %p1838_p2 = pnand %p1836_p1, %p1833_p0 }
   0x8   :  { %1841 = shalt.err (!%p1838_p2)
}
   0x9   :  { %s1842_s27 = scalar_lea.vmem %s31_s19, 384  ;;  %p1847_p4 = scmp.lt.s32.totalorder %s31_s19, %s31_s19 }
   0xa   :  { %p1843_p3 = scmp.ne.s32.totalorder %s31_s19, %s1842_s27  ;;  %p1848_p5 = scmp.lt.s32.totalorder %s1842_s27, %s1842_s27 }
   0xc   :  { %p1849_p6 = por %p1848_p5, %p1847_p4 }
   0xe   :  { %p1850_p7 = pnand %p1849_p6, %p1843_p3 }
  0x10   :  { %1853 = shalt.err (!%p1850_p7)
}
  0x11   :  { %s1927_s28 = smov 192   ;;  %s1928_s29 = smov 12  }
  0x12   :  { %36 = dma.hbm_to_vmem [thread:$0]  %s2483_s1, 384, %s31_s19, [#allocation7], %s1927_s28, %s1927_s28, %s1928_s29  }
  0x13   :  { %s1929_s7 = smov [#allocation3]   ;;  %s1854_s11 = scalar_lea.hbm %s2482_s0, 512 }
  0x14   :  { %s18_s8 = sshll.u32 %s1929_s7, 4  ;;  %p1855_p8 = scmp.ne.s32.totalorder %s2482_s0, %s1854_s11  ;;  %s19_s8 = int_to_ptr.vmem [resolvable:$true] %s18_s8 }
  0x15   :  { %p1858_p9 = scmp.lt.u32.totalorder %s1854_s11, %s2482_s0 }
  0x17   :  { %p1860_p10 = pnand %p1858_p9, %p1855_p8 }
  0x19   :  { %1863 = shalt.err (!%p1860_p10)
}
  0x1a   :  { %s1864_s16 = scalar_lea.vmem %s19_s8, 512  ;;  %p1869_p12 = scmp.lt.s32.totalorder %s19_s8, %s19_s8 }
  0x1b   :  { %p1865_p11 = scmp.ne.s32.totalorder %s19_s8, %s1864_s16  ;;  %p1870_p13 = scmp.lt.s32.totalorder %s1864_s16, %s1864_s16 }
  0x1d   :  { %p1871_p0 = por %p1870_p13, %p1869_p12 }
  0x1f   :  { %p1872_p1 = pnand %p1871_p0, %p1865_p11 }
  0x21   :  { %1875 = shalt.err (!%p1872_p1)
}
  0x22   :  { %s1930_s1 = smov 64   ;;  %s1931_s17 = smov 4  }
  0x23   :  { %24 = dma.hbm_to_vmem [thread:$0]  %s2482_s0, 512, %s19_s8, [#allocation4], %s1930_s1, %s1930_s1, %s1931_s17  }
  0x24   :  { %s1932_s20 = smov [#allocation8]   ;;  %s1876_s24 = scalar_lea.hbm %s2484_s2, 3072 }
  0x25   :  { %s42_s21 = sshll.u32 %s1932_s20, 4  ;;  %p1877_p2 = scmp.ne.s32.totalorder %s2484_s2, %s1876_s24  ;;  %s43_s21 = int_to_ptr.vmem [resolvable:$true] %s42_s21 }
  0x26   :  { %p1880_p3 = scmp.lt.u32.totalorder %s1876_s24, %s2484_s2 }
  0x28   :  { %p1882_p4 = pnand %p1880_p3, %p1877_p2 }
  0x2a   :  { %1885 = shalt.err (!%p1882_p4)
}
  0x2b   :  { %s1886_s6 = scalar_lea.vmem %s43_s21, 3072  ;;  %p1891_p6 = scmp.lt.s32.totalorder %s43_s21, %s43_s21 }
  0x2c   :  { %p1887_p5 = scmp.ne.s32.totalorder %s43_s21, %s1886_s6  ;;  %p1892_p7 = scmp.lt.s32.totalorder %s1886_s6, %s1886_s6 }
  0x2e   :  { %p1893_p8 = por %p1892_p7, %p1891_p6 }
  0x30   :  { %p1894_p9 = pnand %p1893_p8, %p1887_p5 }
  0x32   :  { %1897 = shalt.err (!%p1894_p9)
}
  0x33   :  { %48 = dma.hbm_to_vmem [thread:$0]  %s2484_s2, 3072, %s43_s21, [#allocation7], %s1927_s28, %s1927_s28, %s1928_s29  }
  0x34   :  { %1920 = dma.done.wait [#allocation4], 512  }
  0x35   :  { %1921 = vsyncadd [#allocation4], 4294966784 }
  0x36   :  { %1922 = dma.done.wait [#allocation7], 3456  }
  0x37   :  { %1923 = vsyncadd [#allocation7], 4294963840  ;;  %v2488_v0 = vmov 0   ;;  %v1689_v1 = vld [vmem:[#allocation6 + $0x4] ss:$12 sps:$4 sm:$0xff]   ;;  %vm128_vm0 = vcmask 130048   ;;  %v77_v33 = vlaneseq }
  0x38   :  { %173 = vmatprep.mubr.bf16.mxu0 %v2488_v0  ;;  %v1691_v2 = vld [vmem:[#allocation6] ss:$12 sps:$4 sm:$0xff]   ;;  %141 = vmatprep.subr.bf16.mxu0 %v1689_v1  ;;  %v2012_v4 = vld [vmem:[#allocation8 + $0x4] ss:$12 sps:$4 sm:$0xff]   ;;  %v2014_v5 = vld [vmem:[#allocation8] ss:$12 sps:$4 sm:$0xff]  }
  0x39   :  { %v1692_v3 = vld [vmem:[#allocation3] sm:$0xff]   ;;  %142 = vmatpush1.bf16.msra.mxu0 %v1691_v2  ;;  %v2022_v7 = vld [vmem:[#allocation8 + $0x18] ss:$12 sps:$4 sm:$0xff]   ;;  %v2026_v8 = vld [vmem:[#allocation8 + $0x34] ss:$12 sps:$4 sm:$0xff]   ;;  %v2490_v16 = vmov 0.0  }
  0x3a   :  { %v2016_v6 = vld [vmem:[#allocation8 + $0x1c] ss:$12 sps:$4 sm:$0xff]   ;;  %1508 = vmatprep.mubr.msk.bf16.mxu1 %vm128_vm0, %v1692_v3  ;;  %473 = vmatprep.subr.bf16.mxu0 %v2012_v4  ;;  %v1699_v9 = vld [vmem:[#allocation3 + $0x8] sm:$0xff]   ;;  %v2032_v12 = vld [vmem:[#allocation8 + $0x4c] ss:$12 sps:$4 sm:$0xff]   ;;  %vm1935_vm1 = vmmov 0  }
  0x3b   :  { %v2028_v10 = vld [vmem:[#allocation8 + $0x30] ss:$12 sps:$4 sm:$0xff]   ;;  %v2035_v13 = vld [vmem:[#allocation8 + $0x48] ss:$12 sps:$4 sm:$0xff]   ;;  %v2047_v18 = vld [vmem:[#allocation8 + $0x20] ss:$12 sps:$4 sm:$0xff]  }
  0x3c   :  { %1380 = vmatmul.mubr.msk.bf16.vlgmr.msra.gmra.mrb[0].mxu0 %vm128_vm0, %v1692_v3  ;;  %v1710_v11 = vld [vmem:[#allocation6 + $0x8] ss:$12 sps:$4 sm:$0xff]   ;;  %v2043_v17 = vld [vmem:[#allocation8 + $0x8] ss:$12 sps:$4 sm:$0xff]   ;;  %v2051_v19 = vld [vmem:[#allocation8 + $0x60] ss:$12 sps:$4 sm:$0xff]  }
  0x3d   :  { %474 = vmatpush1.bf16.msra.mxu0 %v2014_v5  ;;  %183 = vmatprep.mubr.bf16.mxu0 %v2488_v0  ;;  %v1706_v14 = vld [vmem:[#allocation3 + $0x10] sm:$0xff]   ;;  %v2039_v15 = vld [vmem:[#allocation8 + $0x64] ss:$12 sps:$4 sm:$0xff]   ;;  %v2066_v24 = vld [vmem:[#allocation8 + $0x94] ss:$12 sps:$4 sm:$0xff]   ;;  %v78_v34 = vshrl.u32 %v77_v33, 7 }
  0x3e   :  { %475 = vmatprep.subr.bf16.mxu0 %v2016_v6  ;;  %1506 = vmatprep.subr.bf16.mxu1 %v1710_v11  ;;  %v2055_v20 = vld [vmem:[#allocation8 + $0x7c] ss:$12 sps:$4 sm:$0xff]   ;;  %v2057_v21 = vld [vmem:[#allocation8 + $0x78] ss:$12 sps:$4 sm:$0xff]   ;;  %v2093_v30 = vld [vmem:[#allocation8 + $0x80] ss:$12 sps:$4 sm:$0xff]  }
  0x3f   :  { %1507 = vmatpush3.bf16.msra.mxu1 %v1710_v11  ;;  %v2061_v22 = vld [vmem:[#allocation8 + $0x38] ss:$12 sps:$4 sm:$0xff]   ;;  %v2071_v25 = vld [vmem:[#allocation8 + $0x50] ss:$12 sps:$4 sm:$0xff]   ;;  %v2084_v28 = vld [vmem:[#allocation8 + $0x68] ss:$12 sps:$4 sm:$0xff]  }
  0x40   :  { %1516 = vmatprep.subr.bf16.mxu1 %v2490_v16  ;;  %v1714_v23 = vld [vmem:[#allocation3 + $0x18] sm:$0xff]   ;;  %v2076_v26 = vld [vmem:[#allocation8 + $0x90] ss:$12 sps:$4 sm:$0xff]   ;;  %v2080_v27 = vld [vmem:[#allocation8 + $0xac] ss:$12 sps:$4 sm:$0xff]   ;;  %v79_v35 = vsub.s32 0, %v78_v34 }
  0x41   :  { %476 = vmatpush1.bf16.msra.mxu0 %v2022_v7  ;;  %v2087_v29 = vld [vmem:[#allocation8 + $0xa8] ss:$12 sps:$4 sm:$0xff]   ;;  %v2100_v31 = vld [vmem:[#allocation8 + $0x98] ss:$12 sps:$4 sm:$0xff]   ;;  %v2107_v32 = vld [vmem:[#allocation8 + $0xb0] ss:$12 sps:$4 sm:$0xff]  }
  0x42   :  { %477 = vmatprep.subr.bf16.mxu0 %v2026_v8  ;;  %1509 = vmatmul.mubr.msk.bf16.vlgmr.msra.gmra.mrb[0].mxu1 %vm128_vm0, %v1699_v9  ;;  %v75_v36 = vld [vmem:[%s2485_s3] sm:$0x7]  ;;  %v83_v37 = vsub.s32 1, %v78_v34  ;;  %v87_v46 = vsub.s32 2, %v78_v34 }
  0x43   :  { %1517 = vmatpush3.bf16.msra.mxu1 %v2043_v17  ;;  %1512 = vmatprep.mubr.msk.bf16.mxu1 %vm128_vm0, %v1706_v14  ;;  %v80_v39 = vrot.slane %v75_v36, %v79_v35 }
  0x44   :  { %1381 = vmatmul.mubr.msk.bf16.gmra.mrb[4].mxu0 %vm128_vm0, %v1699_v9  ;;  %1518 = vmatprep.subr.bf16.mxu1 %v2490_v16  ;;  %v84_v41 = vrot.slane %v75_v36, %v83_v37  ;;  %v2152_v48 = vrot.slane %v75_v36, %v87_v46 }
  0x45   :  { %478 = vmatpush1.bf16.msra.mxu0 %v2028_v10  ;;  %193 = vmatprep.mubr.bf16.mxu0 %v2488_v0 }
  0x46   :  { %479 = vmatprep.subr.bf16.mxu0 %v2032_v12 }
  0x47   :  { %1519 = vmatpush3.bf16.msra.mxu1 %v2047_v18 }
  0x48   :  { %1520 = vmatprep.subr.bf16.mxu1 %v2490_v16 }
  0x49   :  { %480 = vmatpush1.bf16.msra.mxu0 %v2035_v13 }
  0x4a   :  { %481 = vmatprep.subr.bf16.mxu0 %v2039_v15  ;;  %1513 = vmatmul.mubr.msk.bf16.gmra.mrb[4].mxu1 %vm128_vm0, %v1714_v23 }
  0x4b   :  { %1521 = vmatpush3.bf16.msra.mxu1 %v2061_v22  ;;  %1532 = vmatprep.mubr.msk.bf16.mxu1 %vm1935_vm1, %v2490_v16 }
  0x4c   :  { %1382 = vmatmul.mubr.msk.bf16.gmra.mrb[8].mxu0 %vm128_vm0, %v1706_v14  ;;  %1522 = vmatprep.subr.bf16.mxu1 %v2490_v16 }
  0x4d   :  { %482 = vmatpush1.bf16.msra.mxu0 %v2051_v19  ;;  %203 = vmatprep.mubr.bf16.mxu0 %v2488_v0 }
  0x4e   :  { %483 = vmatprep.subr.bf16.mxu0 %v2055_v20 }
  0x4f   :  { %1523 = vmatpush3.bf16.msra.mxu1 %v2071_v25 }
  0x50   :  { %1524 = vmatprep.subr.bf16.mxu1 %v2490_v16 }
  0x51   :  { %484 = vmatpush1.bf16.msra.mxu0 %v2057_v21 }
  0x52   :  { %485 = vmatprep.subr.bf16.mxu0 %v2066_v24 }
  0x53   :  { %1525 = vmatpush3.bf16.msra.mxu1 %v2084_v28 }
  0x54   :  { %1383 = vmatmul.mubr.msk.bf16.gmra.mrb[12].mxu0 %vm128_vm0, %v1714_v23  ;;  %1526 = vmatprep.subr.bf16.mxu1 %v2490_v16 }
  0x55   :  { %486 = vmatpush1.bf16.msra.mxu0 %v2076_v26  ;;  %505 = vmatprep.mubr.bf16.mxu0 %v2488_v0 }
  0x56   :  { %487 = vmatprep.subr.bf16.mxu0 %v2080_v27 }
  0x57   :  { %1527 = vmatpush3.bf16.msra.mxu1 %v2093_v30 }
  0x58   :  { %1528 = vmatprep.subr.bf16.mxu1 %v2490_v16 }
  0x59   :  { %488 = vmatpush1.bf16.msra.mxu0 %v2087_v29 }
  0x5a   :  { %583 = vmatprep.subr.bf16.mxu0 %v2012_v4 }
  0x5b   :  { %1529 = vmatpush3.bf16.msra.mxu1 %v2100_v31 }
  0x5c   :  { %506 = vmatmul.mubr.bf16.vlgmr.msra.gmra.mrb[16].mxu0 %v2488_v0  ;;  %1530 = vmatprep.subr.bf16.mxu1 %v2490_v16 }
  0x5d   :  { %584 = vmatpush1.bf16.msra.mxu0 %v2014_v5  ;;  %615 = vmatprep.mubr.bf16.mxu0 %v2488_v0 }
  0x5e   :  { %585 = vmatprep.subr.bf16.mxu0 %v2016_v6 }
  0x5f   :  { %1531 = vmatpush3.bf16.msra.mxu1 %v2107_v32 }
  0x60   :  { %1536 = vmatprep.subr.bf16.mxu1 %v2490_v16 }
  0x61   :  { %586 = vmatpush1.bf16.msra.mxu0 %v2022_v7 }
  0x62   :  { %587 = vmatprep.subr.bf16.mxu0 %v2026_v8  ;;  %1533 = vmatmul.mubr.bf16.vlgmr.msra.gmra.mrb[8].mxu1 %v2488_v0 }
  0x63   :  { %1537 = vmatpush3.bf16.msra.mxu1 %v2043_v17  ;;  %1552 = vmatprep.mubr.msk.bf16.mxu1 %vm1935_vm1, %v2490_v16 }
  0x64   :  { %1538 = vmatprep.subr.bf16.mxu1 %v2490_v16 }
  0x65   :  { %588 = vmatpush1.bf16.msra.mxu0 %v2028_v10 }
  0x66   :  { %589 = vmatprep.subr.bf16.mxu0 %v2032_v12 }
  0x67   :  { %1539 = vmatpush3.bf16.msra.mxu1 %v2047_v18 }
  0x68   :  { %1540 = vmatprep.subr.bf16.mxu1 %v2490_v16 }
  0x69   :  { %590 = vmatpush1.bf16.msra.mxu0 %v2035_v13 }
  0x6a   :  { %591 = vmatprep.subr.bf16.mxu0 %v2039_v15 }
  0x6b   :  { %1541 = vmatpush3.bf16.msra.mxu1 %v2061_v22 }
  0x6c   :  { %1542 = vmatprep.subr.bf16.mxu1 %v2490_v16 }
  0x6d   :  { %592 = vmatpush1.bf16.msra.mxu0 %v2051_v19 }
  0x6e   :  { %593 = vmatprep.subr.bf16.mxu0 %v2055_v20 }
  0x6f   :  { %1543 = vmatpush3.bf16.msra.mxu1 %v2071_v25 }
  0x70   :  { %1544 = vmatprep.subr.bf16.mxu1 %v2490_v16 }
  0x71   :  { %594 = vmatpush1.bf16.msra.mxu0 %v2057_v21 }
  0x72   :  { %595 = vmatprep.subr.bf16.mxu0 %v2066_v24 }
  0x73   :  { %1545 = vmatpush3.bf16.msra.mxu1 %v2084_v28 }
  0x74   :  { %1546 = vmatprep.subr.bf16.mxu1 %v2490_v16 }
  0x75   :  { %596 = vmatpush1.bf16.msra.mxu0 %v2076_v26 }
  0x76   :  { %597 = vmatprep.subr.bf16.mxu0 %v2080_v27 }
  0x77   :  { %1547 = vmatpush3.bf16.msra.mxu1 %v2093_v30 }
  0x78   :  { %1548 = vmatprep.subr.bf16.mxu1 %v2490_v16 }
  0x79   :  { %598 = vmatpush1.bf16.msra.mxu0 %v2087_v29 }
  0x7a   :  { %694 = vmatprep.subr.bf16.mxu0 %v2012_v4 }
  0x7b   :  { %1549 = vmatpush3.bf16.msra.mxu1 %v2100_v31 }
  0x7c   :  { %1550 = vmatprep.subr.bf16.mxu1 %v2490_v16 }
  0x7f   :  { %1551 = vmatpush3.bf16.msra.mxu1 %v2107_v32 }
  0x80   :  { %1556 = vmatprep.subr.bf16.mxu1 %v2490_v16 }
 0x10f   :  { %v175_v38 = vpop.f32.mrb[0].mxu0 }
 0x110   :  { %v177_v40 = vpop.f32.mrb[1].mxu0 }
 0x111   :  { %v179_v42 = vpop.f32.mrb[2].mxu0 }
 0x112   :  { %v2148_v43 = vadd.f32 %v179_v42, %v80_v39  ;;  %v181_v44 = vpop.f32.mrb[3].mxu0 }
 0x113   :  { %v2150_v45 = vadd.f32 %v181_v44, %v84_v41 }
 0x115   :  { %v1510_v55 = vpop.f32.mrb[0].mxu1 }
 0x116   :  { %v2163_v57 = vadd.f32 %v1510_v55, %v2152_v48  ;;  %v248_v58 = vpop.f32.mrb[1].mxu1 }
 0x117   :  { %v185_v47 = vpop.f32.mrb[4].mxu0  ;;  %v1511_v59 = vpop.f32.mrb[2].mxu1 }
 0x118   :  { %v2154_v49 = vadd.f32 %v185_v47, %v80_v39  ;;  %v187_v50 = vpop.f32.mrb[5].mxu0  ;;  %v2166_v60 = vadd.f32 %v1511_v59, %v2152_v48  ;;  %v251_v61 = vpop.f32.mrb[3].mxu1 }
 0x119   :  { %v2156_v51 = vadd.f32 %v187_v50, %v84_v41  ;;  %v189_v52 = vpop.f32.mrb[6].mxu0  ;;  %v2169_v62 = vadd.f32 %v251_v61, %v2152_v48 }
 0x11a   :  { %v2158_v53 = vadd.f32 %v189_v52, %v80_v39  ;;  %v191_v54 = vpop.f32.mrb[7].mxu0 }
 0x11b   :  { %v2160_v56 = vadd.f32 %v191_v54, %v84_v41 }
 0x11d   :  { %v1514_v23 = vpop.f32.mrb[4].mxu1 }
 0x11e   :  { %v2180_v34 = vadd.f32 %v1514_v23, %v2152_v48  ;;  %v264_v35 = vpop.f32.mrb[5].mxu1 }
 0x11f   :  { %v195_v63 = vpop.f32.mrb[8].mxu0  ;;  %v2183_v36 = vadd.f32 %v264_v35, %v2152_v48  ;;  %v1515_v37 = vpop.f32.mrb[6].mxu1 }
 0x120   :  { %v2171_v1 = vadd.f32 %v195_v63, %v80_v39  ;;  %v197_v2 = vpop.f32.mrb[9].mxu0  ;;  %2492 = vst [vmem:[#allocation13_spill] sm:$0xff] %v2180_v34  ;;  %v2186_v42 = vadd.f32 %v1515_v37, %v2152_v48  ;;  %v267_v44 = vpop.f32.mrb[7].mxu1 }
 0x121   :  { %v2173_v3 = vadd.f32 %v197_v2, %v84_v41  ;;  %v199_v9 = vpop.f32.mrb[10].mxu0  ;;  %v2189_v46 = vadd.f32 %v267_v44, %v2152_v48  ;;  %v176_v2 = vadd.f32 %v175_v38, %v80_v39  ;;  %v2202_v38 = vld [vmem:[%s2486_s4] ss:$0 sm:$0xff]  ;;  %s1936_s4 = smov [#allocation9]  }
 0x122   :  { %v2175_v11 = vadd.f32 %v199_v9, %v80_v39  ;;  %v201_v14 = vpop.f32.mrb[11].mxu0  ;;  %2493 = vst [vmem:[#allocation14_spill] sm:$0xff] %v2186_v42  ;;  %v178_v9 = vadd.f32 %v177_v40, %v84_v41  ;;  %s1360_s8 = sshll.u32 %s1936_s4, 4  ;;  %s1361_s8 = int_to_ptr.vmem [resolvable:$true] %s1360_s8 }
 0x123   :  { %v2177_v33 = vadd.f32 %v201_v14, %v84_v41  ;;  %s1898_s9 = scalar_lea.vmem %s1361_s8, 1024  ;;  %p1903_p11 = scmp.lt.s32.totalorder %s1361_s8, %s1361_s8 }
 0x124   :  { %p1899_p10 = scmp.ne.s32.totalorder %s1361_s8, %s1898_s9  ;;  %p1904_p12 = scmp.lt.s32.totalorder %s1898_s9, %s1898_s9 }
 0x126   :  { %p1905_p13 = por %p1904_p12, %p1903_p11 }
 0x127   :  { %v205_v47 = vpop.f32.mrb[12].mxu0 }
 0x128   :  { %v2191_v50 = vadd.f32 %v205_v47, %v80_v39  ;;  %v207_v52 = vpop.f32.mrb[13].mxu0  ;;  %p1906_p0 = pnand %p1905_p13, %p1899_p10 }
 0x129   :  { %v2193_v54 = vadd.f32 %v207_v52, %v84_v41  ;;  %v209_v55 = vpop.f32.mrb[14].mxu0 }
 0x12a   :  { %v2195_v59 = vadd.f32 %v209_v55, %v80_v39  ;;  %v211_v61 = vpop.f32.mrb[15].mxu0 }
 0x12b   :  { %2494 = vst [vmem:[#allocation15_spill] sm:$0xff] %v2193_v54  ;;  %v2197_v63 = vadd.f32 %v211_v61, %v84_v41 }
 0x12c   :  { %2495 = vst [vmem:[#allocation16_spill] sm:$0xff] %v2195_v59 }
 0x12f   :  { %v507_v14 = vpop.f32.mrb[16].mxu0 }
 0x130   :  { %v554_v23 = vadd.f32 %v507_v14, %v176_v2  ;;  %v509_v35 = vpop.f32.mrb[17].mxu0 }
 0x131   :  { %v561_v37 = vadd.f32 %v509_v35, %v178_v9  ;;  %v511_v44 = vpop.f32.mrb[18].mxu0 }
 0x132   :  { %v1413_v0 = vmul.f32 -1.442695, %v554_v23  ;;  %v512_v16 = vpop.f32.mrb[19].mxu0 }
 0x133   :  { %v1414_v47 = vmul.f32 -1.442695, %v561_v37 }
 0x134   :  { %1729 = vpow2.f32 %v1413_v0  ;;  %v249_v0 = vadd.f32 %v248_v58, %v2152_v48  ;;  %v2496_v48 = vmov 0.0   ;;  %v2497_v58 = vmov 0  }
 0x135   :  { %v548_v42 = vpop.f32.mrb[8].mxu1  ;;  %1731 = vpow2.f32 %v1414_v47 }
 0x136   :  { %v1534_v52 = vpop.f32.mrb[9].mxu1  ;;  %v568_v40 = vadd.f32 %v2202_v38, %v548_v42 }
 0x137   :  { %v551_v34 = vpop.f32.mrb[10].mxu1 }
 0x138   :  { %v1535_v55 = vpop.f32.mrb[11].mxu1 }
 0x13e   :  { %v1730_v59 = vpop.eup %1729 }
 0x13f   :  { %v558_v54 = vadd.f32 1.0, %v1730_v59  ;;  %v1732_v61 = vpop.eup %1731 }
 0x140   :  { %v565_v39 = vadd.f32 1.0, %v1732_v61 }
 0x141   :  { %1733 = vrcp.f32 %v558_v54 }
 0x142   :  { %1735 = vrcp.f32 %v565_v39 }
 0x14b   :  { %v1734_v16 = vpop.eup %1733 }
 0x14c   :  { %v569_v41 = vmul.f32 %v1734_v16, %v568_v40  ;;  %v1736_v34 = vpop.eup %1735 }
 0x14d   :  { %v572_v9 = vsub.f32 1.0, %v1736_v34  ;;  %v574_v14 = vmul.f32 0.0, %v1736_v34 }
 0x14e   :  { %v570_v2 = vadd.f32 %v569_v41, %v249_v0 }
 0x150   :  { %1737 = vtanh.f32 %v570_v2 }
 0x15a   :  { %v1738_v59 = vpop.eup %1737 }
 0x15b   :  { %v573_v54 = vmul.f32 %v1738_v59, %v572_v9 }
 0x15d   :  { %v2206_v23 = vadd.f32 %v574_v14, %v573_v54 }
 0x15f   :  { %v576_v35 = vmax.f32 %v2206_v23, 0.0  ;;  %v578_v37 = vpack.c.bf16 %v2206_v23, %v2206_v23 }
 0x161   :  { %577 = vst [vmem:[#allocation9] sm:$0xff] %v576_v35  ;;  %616 = vmatmul.mubr.bf16.vlgmr.msra.gmra.mrb[20].mxu0 %v578_v37  ;;  %1553 = vmatmul.mubr.bf16.vlgmr.msra.gmra.mrb[12].mxu1 %v578_v37 }
 0x162   :  { %695 = vmatpush1.bf16.msra.mxu0 %v2014_v5  ;;  %1557 = vmatpush3.bf16.msra.mxu1 %v2043_v17 }
 0x163   :  { %696 = vmatprep.subr.bf16.mxu0 %v2016_v6  ;;  %1558 = vmatprep.subr.bf16.mxu1 %v2496_v48 }
 0x164   :  { %726 = vmatprep.mubr.bf16.mxu0 %v2497_v58  ;;  %1572 = vmatprep.mubr.msk.bf16.mxu1 %vm1935_vm1, %v2496_v48 }
 0x166   :  { %697 = vmatpush1.bf16.msra.mxu0 %v2022_v7  ;;  %1559 = vmatpush3.bf16.msra.mxu1 %v2047_v18 }
 0x167   :  { %698 = vmatprep.subr.bf16.mxu0 %v2026_v8  ;;  %1560 = vmatprep.subr.bf16.mxu1 %v2496_v48 }
 0x16a   :  { %699 = vmatpush1.bf16.msra.mxu0 %v2028_v10  ;;  %1561 = vmatpush3.bf16.msra.mxu1 %v2061_v22 }
 0x16b   :  { %700 = vmatprep.subr.bf16.mxu0 %v2032_v12  ;;  %1562 = vmatprep.subr.bf16.mxu1 %v2496_v48 }
 0x16e   :  { %701 = vmatpush1.bf16.msra.mxu0 %v2035_v13  ;;  %1563 = vmatpush3.bf16.msra.mxu1 %v2071_v25 }
 0x16f   :  { %702 = vmatprep.subr.bf16.mxu0 %v2039_v15  ;;  %1564 = vmatprep.subr.bf16.mxu1 %v2496_v48 }
 0x172   :  { %703 = vmatpush1.bf16.msra.mxu0 %v2051_v19  ;;  %1565 = vmatpush3.bf16.msra.mxu1 %v2084_v28 }
 0x173   :  { %704 = vmatprep.subr.bf16.mxu0 %v2055_v20  ;;  %1566 = vmatprep.subr.bf16.mxu1 %v2496_v48 }
 0x176   :  { %705 = vmatpush1.bf16.msra.mxu0 %v2057_v21  ;;  %1567 = vmatpush3.bf16.msra.mxu1 %v2093_v30 }
 0x177   :  { %706 = vmatprep.subr.bf16.mxu0 %v2066_v24  ;;  %1568 = vmatprep.subr.bf16.mxu1 %v2496_v48 }
 0x17a   :  { %707 = vmatpush1.bf16.msra.mxu0 %v2076_v26  ;;  %1569 = vmatpush3.bf16.msra.mxu1 %v2100_v31 }
 0x17b   :  { %708 = vmatprep.subr.bf16.mxu0 %v2080_v27  ;;  %1570 = vmatprep.subr.bf16.mxu1 %v2496_v48 }
 0x17e   :  { %709 = vmatpush1.bf16.msra.mxu0 %v2087_v29  ;;  %1571 = vmatpush3.bf16.msra.mxu1 %v2107_v32 }
 0x17f   :  { %805 = vmatprep.subr.bf16.mxu0 %v2012_v4  ;;  %1576 = vmatprep.subr.bf16.mxu1 %v2496_v48 }
 0x234   :  { %v617_v42 = vpop.f32.mrb[20].mxu0  ;;  %v658_v44 = vpop.f32.mrb[12].mxu1 }
 0x235   :  { %v664_v47 = vadd.f32 %v617_v42, %v2148_v43  ;;  %v619_v52 = vpop.f32.mrb[21].mxu0  ;;  %v1554_v55 = vpop.f32.mrb[13].mxu1  ;;  %v678_v14 = vadd.f32 %v2202_v38, %v658_v44 }
 0x236   :  { %v671_v61 = vadd.f32 %v619_v52, %v2150_v45  ;;  %v621_v39 = vpop.f32.mrb[22].mxu0  ;;  %v661_v40 = vpop.f32.mrb[14].mxu1 }
 0x237   :  { %v1415_v16 = vmul.f32 -1.442695, %v664_v47  ;;  %v622_v0 = vpop.f32.mrb[23].mxu0  ;;  %v1555_v41 = vpop.f32.mrb[15].mxu1 }
 0x238   :  { %v1416_v2 = vmul.f32 -1.442695, %v671_v61 }
 0x239   :  { %1739 = vpow2.f32 %v1415_v16 }
 0x23a   :  { %1741 = vpow2.f32 %v1416_v2 }
 0x243   :  { %v1740_v34 = vpop.eup %1739 }
 0x244   :  { %v668_v9 = vadd.f32 1.0, %v1740_v34  ;;  %v1742_v59 = vpop.eup %1741 }
 0x245   :  { %v675_v54 = vadd.f32 1.0, %v1742_v59 }
 0x246   :  { %1743 = vrcp.f32 %v668_v9 }
 0x247   :  { %1745 = vrcp.f32 %v675_v54 }
 0x250   :  { %v1744_v43 = vpop.eup %1743 }
 0x251   :  { %v679_v35 = vmul.f32 %v1744_v43, %v678_v14  ;;  %v1746_v37 = vpop.eup %1745 }
 0x252   :  { %v682_v42 = vsub.f32 1.0, %v1746_v37  ;;  %v684_v55 = vmul.f32 %v1746_v37, %v2206_v23 }
 0x253   :  { %v680_v45 = vadd.f32 %v679_v35, %v2169_v62 }
 0x255   :  { %1747 = vtanh.f32 %v680_v45 }
 0x25f   :  { %v1748_v47 = vpop.eup %1747 }
 0x260   :  { %v683_v52 = vmul.f32 %v1748_v47, %v682_v42 }
 0x262   :  { %v2251_v61 = vadd.f32 %v684_v55, %v683_v52 }
 0x264   :  { %v686_v39 = vmax.f32 %v2251_v61, 0.0  ;;  %v689_v40 = vpack.c.bf16 %v2251_v61, %v2251_v61 }
 0x266   :  { %688 = vst [vmem:[#allocation9 + $0x8] sm:$0xff] %v686_v39  ;;  %727 = vmatmul.mubr.bf16.vlgmr.msra.gmra.mrb[24].mxu0 %v689_v40  ;;  %1573 = vmatmul.mubr.bf16.vlgmr.msra.gmra.mrb[16].mxu1 %v689_v40 }
 0x267   :  { %806 = vmatpush1.bf16.msra.mxu0 %v2014_v5  ;;  %1577 = vmatpush3.bf16.msra.mxu1 %v2043_v17 }
 0x268   :  { %807 = vmatprep.subr.bf16.mxu0 %v2016_v6  ;;  %1578 = vmatprep.subr.bf16.mxu1 %v2496_v48 }
 0x269   :  { %837 = vmatprep.mubr.bf16.mxu0 %v2497_v58  ;;  %1592 = vmatprep.mubr.msk.bf16.mxu1 %vm1935_vm1, %v2496_v48 }
 0x26b   :  { %808 = vmatpush1.bf16.msra.mxu0 %v2022_v7  ;;  %1579 = vmatpush3.bf16.msra.mxu1 %v2047_v18 }
 0x26c   :  { %809 = vmatprep.subr.bf16.mxu0 %v2026_v8  ;;  %1580 = vmatprep.subr.bf16.mxu1 %v2496_v48 }
 0x26f   :  { %810 = vmatpush1.bf16.msra.mxu0 %v2028_v10  ;;  %1581 = vmatpush3.bf16.msra.mxu1 %v2061_v22 }
 0x270   :  { %811 = vmatprep.subr.bf16.mxu0 %v2032_v12  ;;  %1582 = vmatprep.subr.bf16.mxu1 %v2496_v48 }
 0x273   :  { %812 = vmatpush1.bf16.msra.mxu0 %v2035_v13  ;;  %1583 = vmatpush3.bf16.msra.mxu1 %v2071_v25 }
 0x274   :  { %813 = vmatprep.subr.bf16.mxu0 %v2039_v15  ;;  %1584 = vmatprep.subr.bf16.mxu1 %v2496_v48 }
 0x277   :  { %814 = vmatpush1.bf16.msra.mxu0 %v2051_v19  ;;  %1585 = vmatpush3.bf16.msra.mxu1 %v2084_v28 }
 0x278   :  { %815 = vmatprep.subr.bf16.mxu0 %v2055_v20  ;;  %1586 = vmatprep.subr.bf16.mxu1 %v2496_v48 }
 0x27b   :  { %816 = vmatpush1.bf16.msra.mxu0 %v2057_v21  ;;  %1587 = vmatpush3.bf16.msra.mxu1 %v2093_v30 }
 0x27c   :  { %817 = vmatprep.subr.bf16.mxu0 %v2066_v24  ;;  %1588 = vmatprep.subr.bf16.mxu1 %v2496_v48 }
 0x27f   :  { %818 = vmatpush1.bf16.msra.mxu0 %v2076_v26  ;;  %1589 = vmatpush3.bf16.msra.mxu1 %v2100_v31 }
 0x280   :  { %819 = vmatprep.subr.bf16.mxu0 %v2080_v27  ;;  %1590 = vmatprep.subr.bf16.mxu1 %v2496_v48 }
 0x283   :  { %820 = vmatpush1.bf16.msra.mxu0 %v2087_v29  ;;  %1591 = vmatpush3.bf16.msra.mxu1 %v2107_v32 }
 0x284   :  { %916 = vmatprep.subr.bf16.mxu0 %v2012_v4  ;;  %1596 = vmatprep.subr.bf16.mxu1 %v2496_v48 }
 0x339   :  { %v728_v62 = vpop.f32.mrb[24].mxu0  ;;  %v769_v23 = vpop.f32.mrb[16].mxu1 }
 0x33a   :  { %v775_v44 = vadd.f32 %v728_v62, %v2154_v49  ;;  %v730_v16 = vpop.f32.mrb[25].mxu0  ;;  %v1574_v0 = vpop.f32.mrb[17].mxu1  ;;  %v789_v42 = vadd.f32 %v2202_v38, %v769_v23 }
 0x33b   :  { %v782_v41 = vadd.f32 %v730_v16, %v2156_v51  ;;  %v732_v2 = vpop.f32.mrb[26].mxu0  ;;  %v772_v34 = vpop.f32.mrb[18].mxu1 }
 0x33c   :  { %v1417_v9 = vmul.f32 -1.442695, %v775_v44  ;;  %v733_v59 = vpop.f32.mrb[27].mxu0  ;;  %v1575_v54 = vpop.f32.mrb[19].mxu1 }
 0x33d   :  { %v1418_v14 = vmul.f32 -1.442695, %v782_v41 }
 0x33e   :  { %1749 = vpow2.f32 %v1417_v9 }
 0x33f   :  { %1751 = vpow2.f32 %v1418_v14 }
 0x348   :  { %v1750_v43 = vpop.eup %1749 }
 0x349   :  { %v779_v35 = vadd.f32 1.0, %v1750_v43  ;;  %v1752_v45 = vpop.eup %1751 }
 0x34a   :  { %v786_v37 = vadd.f32 1.0, %v1752_v45 }
 0x34b   :  { %1753 = vrcp.f32 %v779_v35 }
 0x34c   :  { %1755 = vrcp.f32 %v786_v37 }
 0x355   :  { %v1754_v49 = vpop.eup %1753 }
 0x356   :  { %v790_v47 = vmul.f32 %v1754_v49, %v789_v42  ;;  %v1756_v52 = vpop.eup %1755 }
 0x357   :  { %v793_v55 = vsub.f32 1.0, %v1756_v52  ;;  %v795_v62 = vmul.f32 %v1756_v52, %v2251_v61 }
 0x358   :  { %v791_v51 = vadd.f32 %v790_v47, %v2163_v57 }
 0x35a   :  { %1757 = vtanh.f32 %v791_v51 }
 0x364   :  { %v1758_v39 = vpop.eup %1757 }
 0x365   :  { %v794_v40 = vmul.f32 %v1758_v39, %v793_v55 }
 0x367   :  { %v2296_v44 = vadd.f32 %v795_v62, %v794_v40 }
 0x369   :  { %v797_v16 = vmax.f32 %v2296_v44, 0.0  ;;  %v800_v0 = vpack.c.bf16 %v2296_v44, %v2296_v44 }
 0x36b   :  { %799 = vst [vmem:[#allocation9 + $0x10] sm:$0xff] %v797_v16  ;;  %838 = vmatmul.mubr.bf16.vlgmr.msra.gmra.mrb[28].mxu0 %v800_v0  ;;  %1593 = vmatmul.mubr.bf16.vlgmr.msra.gmra.mrb[20].mxu1 %v800_v0 }
 0x36c   :  { %917 = vmatpush1.bf16.msra.mxu0 %v2014_v5  ;;  %1597 = vmatpush3.bf16.msra.mxu1 %v2043_v17 }
 0x36d   :  { %918 = vmatprep.subr.bf16.mxu0 %v2016_v6  ;;  %1598 = vmatprep.subr.bf16.mxu1 %v2496_v48 }
 0x36e   :  { %948 = vmatprep.mubr.bf16.mxu0 %v2497_v58  ;;  %1612 = vmatprep.mubr.msk.bf16.mxu1 %vm1935_vm1, %v2496_v48 }
 0x370   :  { %919 = vmatpush1.bf16.msra.mxu0 %v2022_v7  ;;  %1599 = vmatpush3.bf16.msra.mxu1 %v2047_v18 }
 0x371   :  { %920 = vmatprep.subr.bf16.mxu0 %v2026_v8  ;;  %1600 = vmatprep.subr.bf16.mxu1 %v2496_v48 }
 0x374   :  { %921 = vmatpush1.bf16.msra.mxu0 %v2028_v10  ;;  %1601 = vmatpush3.bf16.msra.mxu1 %v2061_v22 }
 0x375   :  { %922 = vmatprep.subr.bf16.mxu0 %v2032_v12  ;;  %1602 = vmatprep.subr.bf16.mxu1 %v2496_v48 }
 0x378   :  { %923 = vmatpush1.bf16.msra.mxu0 %v2035_v13  ;;  %1603 = vmatpush3.bf16.msra.mxu1 %v2071_v25 }
 0x379   :  { %924 = vmatprep.subr.bf16.mxu0 %v2039_v15  ;;  %1604 = vmatprep.subr.bf16.mxu1 %v2496_v48 }
 0x37c   :  { %925 = vmatpush1.bf16.msra.mxu0 %v2051_v19  ;;  %1605 = vmatpush3.bf16.msra.mxu1 %v2084_v28 }
 0x37d   :  { %926 = vmatprep.subr.bf16.mxu0 %v2055_v20  ;;  %1606 = vmatprep.subr.bf16.mxu1 %v2496_v48 }
 0x380   :  { %927 = vmatpush1.bf16.msra.mxu0 %v2057_v21  ;;  %1607 = vmatpush3.bf16.msra.mxu1 %v2093_v30 }
 0x381   :  { %928 = vmatprep.subr.bf16.mxu0 %v2066_v24  ;;  %1608 = vmatprep.subr.bf16.mxu1 %v2496_v48 }
 0x384   :  { %929 = vmatpush1.bf16.msra.mxu0 %v2076_v26  ;;  %1609 = vmatpush3.bf16.msra.mxu1 %v2100_v31 }
 0x385   :  { %930 = vmatprep.subr.bf16.mxu0 %v2080_v27  ;;  %1610 = vmatprep.subr.bf16.mxu1 %v2496_v48 }
 0x388   :  { %931 = vmatpush1.bf16.msra.mxu0 %v2087_v29  ;;  %1611 = vmatpush3.bf16.msra.mxu1 %v2107_v32 }
 0x389   :  { %1027 = vmatprep.subr.bf16.mxu0 %v2012_v4  ;;  %1616 = vmatprep.subr.bf16.mxu1 %v2496_v48 }
 0x43e   :  { %v839_v57 = vpop.f32.mrb[28].mxu0  ;;  %v880_v61 = vpop.f32.mrb[20].mxu1 }
 0x43f   :  { %v886_v23 = vadd.f32 %v839_v57, %v2158_v53  ;;  %v841_v41 = vpop.f32.mrb[29].mxu0  ;;  %v1594_v2 = vpop.f32.mrb[21].mxu1  ;;  %v900_v47 = vadd.f32 %v2202_v38, %v880_v61 }
 0x440   :  { %v893_v34 = vadd.f32 %v841_v41, %v2160_v56  ;;  %v843_v9 = vpop.f32.mrb[30].mxu0  ;;  %v883_v59 = vpop.f32.mrb[22].mxu1 }
 0x441   :  { %v1419_v54 = vmul.f32 -1.442695, %v886_v23  ;;  %v844_v14 = vpop.f32.mrb[31].mxu0  ;;  %v1595_v43 = vpop.f32.mrb[23].mxu1 }
 0x442   :  { %v1420_v35 = vmul.f32 -1.442695, %v893_v34 }
 0x443   :  { %1759 = vpow2.f32 %v1419_v54 }
 0x444   :  { %1761 = vpow2.f32 %v1420_v35 }
 0x44d   :  { %v1760_v45 = vpop.eup %1759 }
 0x44e   :  { %v890_v37 = vadd.f32 1.0, %v1760_v45  ;;  %v1762_v42 = vpop.eup %1761 }
 0x44f   :  { %v897_v49 = vadd.f32 1.0, %v1762_v42 }
 0x450   :  { %1763 = vrcp.f32 %v890_v37 }
 0x451   :  { %1765 = vrcp.f32 %v897_v49 }
 0x45a   :  { %v1764_v53 = vpop.eup %1763 }
 0x45b   :  { %v901_v51 = vmul.f32 %v1764_v53, %v900_v47  ;;  %v1766_v52 = vpop.eup %1765 }
 0x45c   :  { %v904_v55 = vsub.f32 1.0, %v1766_v52  ;;  %v906_v62 = vmul.f32 %v1766_v52, %v2296_v44  ;;  %v2402_v52 = vld [vmem:[#allocation8 + $0x18] ss:$12 sps:$4 sm:$0xff]  }
 0x45d   :  { %v902_v56 = vadd.f32 %v901_v51, %v2166_v60 }
 0x45f   :  { %1767 = vtanh.f32 %v902_v56  ;;  %v2391_v56 = vld [vmem:[#allocation8] ss:$12 sps:$4 sm:$0xff]  }
 0x469   :  { %v1768_v39 = vpop.eup %1767 }
 0x46a   :  { %v905_v40 = vmul.f32 %v1768_v39, %v904_v55  ;;  %v2406_v55 = vld [vmem:[#allocation8 + $0x34] ss:$12 sps:$4 sm:$0xff]  }
 0x46c   :  { %v2341_v16 = vadd.f32 %v906_v62, %v905_v40 }
 0x46e   :  { %v908_v0 = vmax.f32 %v2341_v16, 0.0  ;;  %v911_v57 = vpack.c.bf16 %v2341_v16, %v2341_v16 }
 0x470   :  { %910 = vst [vmem:[#allocation9 + $0x18] sm:$0xff] %v908_v0  ;;  %949 = vmatmul.mubr.bf16.vlgmr.msra.gmra.mrb[32].mxu0 %v911_v57  ;;  %1613 = vmatmul.mubr.bf16.vlgmr.msra.gmra.mrb[24].mxu1 %v911_v57 }
 0x471   :  { %1028 = vmatpush1.bf16.msra.mxu0 %v2014_v5  ;;  %1617 = vmatpush3.bf16.msra.mxu1 %v2043_v17 }
 0x472   :  { %1029 = vmatprep.subr.bf16.mxu0 %v2016_v6  ;;  %1618 = vmatprep.subr.bf16.mxu1 %v2496_v48 }
 0x473   :  { %1059 = vmatprep.mubr.bf16.mxu0 %v2497_v58  ;;  %1632 = vmatprep.mubr.msk.bf16.mxu1 %vm1935_vm1, %v2496_v48 }
 0x475   :  { %1030 = vmatpush1.bf16.msra.mxu0 %v2022_v7  ;;  %1619 = vmatpush3.bf16.msra.mxu1 %v2047_v18 }
 0x476   :  { %1031 = vmatprep.subr.bf16.mxu0 %v2026_v8  ;;  %1620 = vmatprep.subr.bf16.mxu1 %v2496_v48 }
 0x479   :  { %1032 = vmatpush1.bf16.msra.mxu0 %v2028_v10  ;;  %1621 = vmatpush3.bf16.msra.mxu1 %v2061_v22 }
 0x47a   :  { %1033 = vmatprep.subr.bf16.mxu0 %v2032_v12  ;;  %1622 = vmatprep.subr.bf16.mxu1 %v2496_v48 }
 0x47d   :  { %1034 = vmatpush1.bf16.msra.mxu0 %v2035_v13  ;;  %1623 = vmatpush3.bf16.msra.mxu1 %v2071_v25 }
 0x47e   :  { %1035 = vmatprep.subr.bf16.mxu0 %v2039_v15  ;;  %1624 = vmatprep.subr.bf16.mxu1 %v2496_v48 }
 0x481   :  { %1036 = vmatpush1.bf16.msra.mxu0 %v2051_v19  ;;  %1625 = vmatpush3.bf16.msra.mxu1 %v2084_v28 }
 0x482   :  { %1037 = vmatprep.subr.bf16.mxu0 %v2055_v20  ;;  %1626 = vmatprep.subr.bf16.mxu1 %v2496_v48 }
 0x485   :  { %1038 = vmatpush1.bf16.msra.mxu0 %v2057_v21  ;;  %1627 = vmatpush3.bf16.msra.mxu1 %v2093_v30 }
 0x486   :  { %1039 = vmatprep.subr.bf16.mxu0 %v2066_v24  ;;  %1628 = vmatprep.subr.bf16.mxu1 %v2496_v48 }
 0x489   :  { %1040 = vmatpush1.bf16.msra.mxu0 %v2076_v26  ;;  %1629 = vmatpush3.bf16.msra.mxu1 %v2100_v31 }
 0x48a   :  { %1041 = vmatprep.subr.bf16.mxu0 %v2080_v27  ;;  %1630 = vmatprep.subr.bf16.mxu1 %v2496_v48 }
 0x48d   :  { %1042 = vmatpush1.bf16.msra.mxu0 %v2087_v29  ;;  %1631 = vmatpush3.bf16.msra.mxu1 %v2107_v32 }
 0x48e   :  { %1138 = vmatprep.subr.bf16.mxu0 %v2012_v4  ;;  %1636 = vmatprep.subr.bf16.mxu1 %v2496_v48 }
 0x543   :  { %v950_v5 = vpop.f32.mrb[32].mxu0  ;;  %v991_v6 = vpop.f32.mrb[24].mxu1 }
 0x544   :  { %v997_v7 = vadd.f32 %v950_v5, %v2171_v1  ;;  %v952_v8 = vpop.f32.mrb[33].mxu0  ;;  %v1614_v10 = vpop.f32.mrb[25].mxu1  ;;  %v1011_v14 = vadd.f32 %v2202_v38, %v991_v6 }
 0x545   :  { %v1004_v60 = vadd.f32 %v952_v8, %v2173_v3  ;;  %v954_v44 = vpop.f32.mrb[34].mxu0  ;;  %v994_v61 = vpop.f32.mrb[26].mxu1 }
 0x546   :  { %v1421_v23 = vmul.f32 -1.442695, %v997_v7  ;;  %v955_v41 = vpop.f32.mrb[35].mxu0  ;;  %v1615_v2 = vpop.f32.mrb[27].mxu1  ;;  %v1817_v44 = vld [vmem:[#allocation8 + $0x38] ss:$12 sps:$4 sm:$0xff]  }
 0x547   :  { %v1422_v34 = vmul.f32 -1.442695, %v1004_v60  ;;  %v1816_v60 = vld [vmem:[#allocation8 + $0x20] ss:$12 sps:$4 sm:$0xff]   ;;  %v1821_v41 = vld [vmem:[#allocation8 + $0x64] ss:$12 sps:$4 sm:$0xff]  }
 0x548   :  { %1769 = vpow2.f32 %v1421_v23  ;;  %v1818_v61 = vld [vmem:[#allocation8 + $0x4c] ss:$12 sps:$4 sm:$0xff]   ;;  %v1820_v23 = vld [vmem:[#allocation8 + $0x50] ss:$12 sps:$4 sm:$0xff]  }
 0x549   :  { %1771 = vpow2.f32 %v1422_v34  ;;  %v1822_v2 = vld [vmem:[#allocation8 + $0x60] ss:$12 sps:$4 sm:$0xff]   ;;  %v1823_v34 = vld [vmem:[#allocation8 + $0x68] ss:$12 sps:$4 sm:$0xff]  }
 0x552   :  { %v1770_v9 = vpop.eup %1769 }
 0x553   :  { %v1001_v4 = vadd.f32 1.0, %v1770_v9  ;;  %v1772_v59 = vpop.eup %1771  ;;  %v1824_v9 = vld [vmem:[#allocation8 + $0x7c] ss:$12 sps:$4 sm:$0xff]  }
 0x554   :  { %v1008_v54 = vadd.f32 1.0, %v1772_v59  ;;  %v1826_v59 = vld [vmem:[#allocation8 + $0x80] ss:$12 sps:$4 sm:$0xff]  }
 0x555   :  { %1773 = vrcp.f32 %v1001_v4  ;;  %v1825_v4 = vld [vmem:[#allocation8 + $0x78] ss:$12 sps:$4 sm:$0xff]  }
 0x556   :  { %1775 = vrcp.f32 %v1008_v54  ;;  %v1827_v54 = vld [vmem:[#allocation8 + $0x94] ss:$12 sps:$4 sm:$0xff]  }
 0x55f   :  { %v1774_v1 = vpop.eup %1773 }
 0x560   :  { %v1012_v43 = vmul.f32 %v1774_v1, %v1011_v14  ;;  %v1776_v35 = vpop.eup %1775  ;;  %v1828_v14 = vld [vmem:[#allocation8 + $0x90] ss:$12 sps:$4 sm:$0xff]   ;;  %v1829_v1 = vld [vmem:[#allocation8 + $0x98] ss:$12 sps:$4 sm:$0xff]  }
 0x561   :  { %v1015_v45 = vsub.f32 1.0, %v1776_v35  ;;  %v1017_v49 = vmul.f32 %v1776_v35, %v2341_v16 }
 0x562   :  { %v1013_v3 = vadd.f32 %v1012_v43, %v2183_v36  ;;  %v2395_v36 = vld [vmem:[#allocation8 + $0x1c] ss:$12 sps:$4 sm:$0xff]   ;;  %v1830_v43 = vld [vmem:[#allocation8 + $0xac] ss:$12 sps:$4 sm:$0xff]  }
 0x564   :  { %1777 = vtanh.f32 %v1013_v3  ;;  %v1831_v3 = vld [vmem:[#allocation8 + $0xa8] ss:$12 sps:$4 sm:$0xff]  }
 0x56e   :  { %v1778_v37 = vpop.eup %1777 }
 0x56f   :  { %v1016_v42 = vmul.f32 %v1778_v37, %v1015_v45 }
 0x571   :  { %v2386_v47 = vadd.f32 %v1017_v49, %v1016_v42 }
 0x573   :  { %v1019_v53 = vmax.f32 %v2386_v47, 0.0  ;;  %v1022_v51 = vpack.c.bf16 %v2386_v47, %v2386_v47 }
 0x575   :  { %1021 = vst [vmem:[#allocation9 + $0x20] sm:$0xff] %v1019_v53  ;;  %1060 = vmatmul.mubr.bf16.vlgmr.msra.gmra.mrb[36].mxu0 %v1022_v51  ;;  %1633 = vmatmul.mubr.bf16.vlgmr.msra.gmra.mrb[28].mxu1 %v1022_v51 }
 0x576   :  { %1139 = vmatpush1.bf16.msra.mxu0 %v2391_v56  ;;  %1637 = vmatpush3.bf16.msra.mxu1 %v2043_v17  ;;  %v2410_v17 = vld [vmem:[#allocation8 + $0x30] ss:$12 sps:$4 sm:$0xff]  }
 0x577   :  { %1140 = vmatprep.subr.bf16.mxu0 %v2395_v36  ;;  %1638 = vmatprep.subr.bf16.mxu1 %v2496_v48 }
 0x578   :  { %1170 = vmatprep.mubr.bf16.mxu0 %v2497_v58  ;;  %1652 = vmatprep.mubr.msk.bf16.mxu1 %vm1935_vm1, %v2496_v48 }
 0x57a   :  { %1141 = vmatpush1.bf16.msra.mxu0 %v2402_v52  ;;  %1639 = vmatpush3.bf16.msra.mxu1 %v2047_v18 }
 0x57b   :  { %1142 = vmatprep.subr.bf16.mxu0 %v2406_v55  ;;  %1640 = vmatprep.subr.bf16.mxu1 %v2496_v48 }
 0x57e   :  { %1143 = vmatpush1.bf16.msra.mxu0 %v2410_v17  ;;  %1641 = vmatpush3.bf16.msra.mxu1 %v2061_v22 }
 0x57f   :  { %1144 = vmatprep.subr.bf16.mxu0 %v2032_v12  ;;  %1642 = vmatprep.subr.bf16.mxu1 %v2496_v48  ;;  %v1814_v12 = vld [vmem:[#allocation8 + $0x4] ss:$12 sps:$4 sm:$0xff]  }
 0x582   :  { %1145 = vmatpush1.bf16.msra.mxu0 %v2035_v13  ;;  %1643 = vmatpush3.bf16.msra.mxu1 %v2071_v25 }
 0x583   :  { %1146 = vmatprep.subr.bf16.mxu0 %v2039_v15  ;;  %1644 = vmatprep.subr.bf16.mxu1 %v2496_v48 }
 0x586   :  { %1147 = vmatpush1.bf16.msra.mxu0 %v2051_v19  ;;  %1645 = vmatpush3.bf16.msra.mxu1 %v2084_v28 }
 0x587   :  { %1148 = vmatprep.subr.bf16.mxu0 %v2055_v20  ;;  %1646 = vmatprep.subr.bf16.mxu1 %v2496_v48 }
 0x58a   :  { %1149 = vmatpush1.bf16.msra.mxu0 %v2057_v21  ;;  %1647 = vmatpush3.bf16.msra.mxu1 %v2093_v30 }
 0x58b   :  { %1150 = vmatprep.subr.bf16.mxu0 %v2066_v24  ;;  %1648 = vmatprep.subr.bf16.mxu1 %v2496_v48 }
 0x58e   :  { %1151 = vmatpush1.bf16.msra.mxu0 %v2076_v26  ;;  %1649 = vmatpush3.bf16.msra.mxu1 %v2100_v31 }
 0x58f   :  { %1152 = vmatprep.subr.bf16.mxu0 %v2080_v27  ;;  %1650 = vmatprep.subr.bf16.mxu1 %v2496_v48 }
 0x592   :  { %1153 = vmatpush1.bf16.msra.mxu0 %v2087_v29  ;;  %1651 = vmatpush3.bf16.msra.mxu1 %v2107_v32 }
 0x593   :  { %1249 = vmatprep.subr.bf16.mxu0 %v1814_v12  ;;  %1656 = vmatprep.subr.bf16.mxu1 %v2496_v48 }
 0x648   :  { %v1061_v13 = vpop.f32.mrb[36].mxu0  ;;  %v1102_v15 = vpop.f32.mrb[28].mxu1 }
 0x649   :  { %v1108_v18 = vadd.f32 %v1061_v13, %v2175_v11  ;;  %v1063_v19 = vpop.f32.mrb[37].mxu0  ;;  %v1634_v20 = vpop.f32.mrb[29].mxu1  ;;  %v1122_v40 = vadd.f32 %v2202_v38, %v1102_v15 }
 0x64a   :  { %v1115_v21 = vadd.f32 %v1063_v19, %v2177_v33  ;;  %v1065_v22 = vpop.f32.mrb[38].mxu0  ;;  %v1105_v24 = vpop.f32.mrb[30].mxu1  ;;  %v2499_v19 = vld [vmem:[#allocation13_spill] sm:$0xff] }
 0x64b   :  { %v1423_v25 = vmul.f32 -1.442695, %v1108_v18  ;;  %v1066_v26 = vpop.f32.mrb[39].mxu0  ;;  %v1635_v27 = vpop.f32.mrb[31].mxu1 }
 0x64c   :  { %v1424_v28 = vmul.f32 -1.442695, %v1115_v21 }
 0x64d   :  { %1779 = vpow2.f32 %v1423_v25 }
 0x64e   :  { %1781 = vpow2.f32 %v1424_v28 }
 0x657   :  { %v1780_v29 = vpop.eup %1779 }
 0x658   :  { %v1112_v30 = vadd.f32 1.0, %v1780_v29  ;;  %v1782_v31 = vpop.eup %1781 }
 0x659   :  { %v1119_v39 = vadd.f32 1.0, %v1782_v31 }
 0x65a   :  { %1783 = vrcp.f32 %v1112_v30 }
 0x65b   :  { %1785 = vrcp.f32 %v1119_v39  ;;  %v2500_v39 = vld [vmem:[#allocation16_spill] sm:$0xff] }
 0x664   :  { %v1784_v11 = vpop.eup %1783 }
 0x665   :  { %v1123_v62 = vmul.f32 %v1784_v11, %v1122_v40  ;;  %v1786_v16 = vpop.eup %1785 }
 0x666   :  { %v1126_v0 = vsub.f32 1.0, %v1786_v16  ;;  %v1128_v6 = vmul.f32 %v1786_v16, %v2386_v47  ;;  %v2498_v47 = vld [vmem:[#allocation15_spill] sm:$0xff] }
 0x667   :  { %v1124_v33 = vadd.f32 %v1123_v62, %v2189_v46  ;;  %v1815_v46 = vld [vmem:[#allocation8 + $0x8] ss:$12 sps:$4 sm:$0xff]  }
 0x669   :  { %1787 = vtanh.f32 %v1124_v33 }
 0x673   :  { %v1788_v57 = vpop.eup %1787 }
 0x674   :  { %v1127_v5 = vmul.f32 %v1788_v57, %v1126_v0 }
 0x676   :  { %v2440_v7 = vadd.f32 %v1128_v6, %v1127_v5 }
 0x678   :  { %v1130_v8 = vmax.f32 %v2440_v7, 0.0  ;;  %v1133_v10 = vpack.c.bf16 %v2440_v7, %v2440_v7 }
 0x67a   :  { %1132 = vst [vmem:[#allocation9 + $0x28] sm:$0xff] %v1130_v8  ;;  %1171 = vmatmul.mubr.bf16.vlgmr.msra.gmra.mrb[40].mxu0 %v1133_v10  ;;  %1653 = vmatmul.mubr.bf16.vlgmr.msra.gmra.mrb[32].mxu1 %v1133_v10 }
 0x67b   :  { %1250 = vmatpush1.bf16.msra.mxu0 %v2391_v56  ;;  %1657 = vmatpush3.bf16.msra.mxu1 %v1815_v46 }
 0x67c   :  { %1251 = vmatprep.subr.bf16.mxu0 %v2395_v36  ;;  %1658 = vmatprep.subr.bf16.mxu1 %v2496_v48 }
 0x67d   :  { %1281 = vmatprep.mubr.bf16.mxu0 %v2497_v58  ;;  %1672 = vmatprep.mubr.msk.bf16.mxu1 %vm1935_vm1, %v2496_v48  ;;  %v1819_v58 = vld [vmem:[#allocation8 + $0x48] ss:$12 sps:$4 sm:$0xff]  }
 0x67f   :  { %1252 = vmatpush1.bf16.msra.mxu0 %v2402_v52  ;;  %1659 = vmatpush3.bf16.msra.mxu1 %v1816_v60 }
 0x680   :  { %1253 = vmatprep.subr.bf16.mxu0 %v2406_v55  ;;  %1660 = vmatprep.subr.bf16.mxu1 %v2496_v48 }
 0x683   :  { %1254 = vmatpush1.bf16.msra.mxu0 %v2410_v17  ;;  %1661 = vmatpush3.bf16.msra.mxu1 %v1817_v44 }
 0x684   :  { %1255 = vmatprep.subr.bf16.mxu0 %v1818_v61  ;;  %1662 = vmatprep.subr.bf16.mxu1 %v2496_v48 }
 0x687   :  { %1256 = vmatpush1.bf16.msra.mxu0 %v1819_v58  ;;  %1663 = vmatpush3.bf16.msra.mxu1 %v1820_v23  ;;  %v2501_v23 = vld [vmem:[#allocation14_spill] sm:$0xff] }
 0x688   :  { %1257 = vmatprep.subr.bf16.mxu0 %v1821_v41  ;;  %1664 = vmatprep.subr.bf16.mxu1 %v2496_v48 }
 0x68b   :  { %1258 = vmatpush1.bf16.msra.mxu0 %v1822_v2  ;;  %1665 = vmatpush3.bf16.msra.mxu1 %v1823_v34 }
 0x68c   :  { %1259 = vmatprep.subr.bf16.mxu0 %v1824_v9  ;;  %1666 = vmatprep.subr.bf16.mxu1 %v2496_v48 }
 0x68f   :  { %1260 = vmatpush1.bf16.msra.mxu0 %v1825_v4  ;;  %1667 = vmatpush3.bf16.msra.mxu1 %v1826_v59 }
 0x690   :  { %1261 = vmatprep.subr.bf16.mxu0 %v1827_v54  ;;  %1668 = vmatprep.subr.bf16.mxu1 %v2496_v48 }
 0x693   :  { %1262 = vmatpush1.bf16.msra.mxu0 %v1828_v14  ;;  %1669 = vmatpush3.bf16.msra.mxu1 %v1829_v1 }
 0x694   :  { %1263 = vmatprep.subr.bf16.mxu0 %v1830_v43  ;;  %1670 = vmatprep.subr.bf16.mxu1 %v2496_v48 }
 0x697   :  { %1264 = vmatpush1.bf16.msra.mxu0 %v1831_v3  ;;  %1671 = vmatpush3.bf16.msra.mxu1 %v2107_v32 }
 0x74d   :  { %v1172_v35 = vpop.f32.mrb[40].mxu0  ;;  %v1213_v45 = vpop.f32.mrb[32].mxu1 }
 0x74e   :  { %v1219_v37 = vadd.f32 %v1172_v35, %v2191_v50  ;;  %v1174_v42 = vpop.f32.mrb[41].mxu0  ;;  %v1654_v49 = vpop.f32.mrb[33].mxu1  ;;  %v1233_v15 = vadd.f32 %v2202_v38, %v1213_v45 }
 0x74f   :  { %v1226_v53 = vadd.f32 %v1174_v42, %v2498_v47  ;;  %v1176_v51 = vpop.f32.mrb[42].mxu0  ;;  %v1216_v56 = vpop.f32.mrb[34].mxu1 }
 0x750   :  { %v1425_v36 = vmul.f32 -1.442695, %v1219_v37  ;;  %v1177_v52 = vpop.f32.mrb[43].mxu0  ;;  %v1655_v55 = vpop.f32.mrb[35].mxu1 }
 0x751   :  { %v1426_v17 = vmul.f32 -1.442695, %v1226_v53 }
 0x752   :  { %1789 = vpow2.f32 %v1425_v36 }
 0x753   :  { %1791 = vpow2.f32 %v1426_v17 }
 0x75c   :  { %v1790_v48 = vpop.eup %1789 }
 0x75d   :  { %v1223_v12 = vadd.f32 1.0, %v1790_v48  ;;  %v1792_v32 = vpop.eup %1791 }
 0x75e   :  { %v1230_v13 = vadd.f32 1.0, %v1792_v32 }
 0x75f   :  { %1793 = vrcp.f32 %v1223_v12 }
 0x760   :  { %1795 = vrcp.f32 %v1230_v13 }
 0x769   :  { %v1794_v50 = vpop.eup %1793 }
 0x76a   :  { %v1234_v18 = vmul.f32 %v1794_v50, %v1233_v15  ;;  %v1796_v21 = vpop.eup %1795 }
 0x76b   :  { %v1237_v22 = vsub.f32 1.0, %v1796_v21  ;;  %v1239_v26 = vmul.f32 %v1796_v21, %v2440_v7 }
 0x76c   :  { %v1235_v20 = vadd.f32 %v1234_v18, %v2499_v19 }
 0x76e   :  { %1797 = vtanh.f32 %v1235_v20 }
 0x778   :  { %v1798_v24 = vpop.eup %1797 }
 0x779   :  { %v1238_v25 = vmul.f32 %v1798_v24, %v1237_v22 }
 0x77b   :  { %v1240_v27 = vadd.f32 %v1239_v26, %v1238_v25 }
 0x77d   :  { %v1241_v28 = vmax.f32 %v1240_v27, 0.0  ;;  %v1244_v29 = vpack.c.bf16 %v1240_v27, %v1240_v27 }
 0x77f   :  { %1243 = vst [vmem:[#allocation9 + $0x30] sm:$0xff] %v1241_v28  ;;  %1282 = vmatmul.mubr.bf16.vlgmr.msra.gmra.mrb[44].mxu0 %v1244_v29  ;;  %1673 = vmatmul.mubr.bf16.vlgmr.msra.gmra.mrb[36].mxu1 %v1244_v29 }
 0x852   :  { %v1283_v30 = vpop.f32.mrb[44].mxu0  ;;  %v1324_v31 = vpop.f32.mrb[36].mxu1 }
 0x853   :  { %v1330_v40 = vadd.f32 %v1283_v30, %v2500_v39  ;;  %v1285_v11 = vpop.f32.mrb[45].mxu0  ;;  %v1674_v62 = vpop.f32.mrb[37].mxu1  ;;  %v1344_v44 = vadd.f32 %v2202_v38, %v1324_v31 }
 0x854   :  { %v1337_v33 = vadd.f32 %v1285_v11, %v2197_v63  ;;  %v1287_v16 = vpop.f32.mrb[46].mxu0  ;;  %v1327_v0 = vpop.f32.mrb[38].mxu1 }
 0x855   :  { %v1427_v57 = vmul.f32 -1.442695, %v1330_v40  ;;  %v1288_v5 = vpop.f32.mrb[47].mxu0  ;;  %v1675_v6 = vpop.f32.mrb[39].mxu1 }
 0x856   :  { %v1428_v7 = vmul.f32 -1.442695, %v1337_v33 }
 0x857   :  { %1799 = vpow2.f32 %v1427_v57 }
 0x858   :  { %1801 = vpow2.f32 %v1428_v7 }
 0x861   :  { %v1800_v8 = vpop.eup %1799 }
 0x862   :  { %v1334_v10 = vadd.f32 1.0, %v1800_v8  ;;  %v1802_v46 = vpop.eup %1801 }
 0x863   :  { %v1341_v60 = vadd.f32 1.0, %v1802_v46 }
 0x864   :  { %1803 = vrcp.f32 %v1334_v10 }
 0x865   :  { %1805 = vrcp.f32 %v1341_v60 }
 0x86e   :  { %v1804_v61 = vpop.eup %1803 }
 0x86f   :  { %v1345_v58 = vmul.f32 %v1804_v61, %v1344_v44  ;;  %v1806_v41 = vpop.eup %1805 }
 0x870   :  { %v1348_v2 = vsub.f32 1.0, %v1806_v41  ;;  %v1350_v4 = vmul.f32 %v1806_v41, %v1240_v27 }
 0x871   :  { %v1346_v63 = vadd.f32 %v1345_v58, %v2501_v23 }
 0x873   :  { %1807 = vtanh.f32 %v1346_v63 }
 0x87d   :  { %v1808_v34 = vpop.eup %1807 }
 0x87e   :  { %v1349_v9 = vmul.f32 %v1808_v34, %v1348_v2 }
 0x880   :  { %v1351_v59 = vadd.f32 %v1350_v4, %v1349_v9 }
 0x882   :  { %v1352_v54 = vmax.f32 %v1351_v59, 0.0 }
 0x884   :  { %1354 = vst [vmem:[#allocation9 + $0x38] sm:$0xff] %v1352_v54 }
 0x885   :  { %1909 = shalt.err (!%p1906_p0)
}
 0x886   :  { %s1910_s12 = scalar_lea.hbm %s2487_s5, 1024 }
 0x887   :  { %p1911_p1 = scmp.ne.s32.totalorder %s2487_s5, %s1910_s12  ;;  %p1914_p2 = scmp.lt.u32.totalorder %s1910_s12, %s2487_s5 }
 0x889   :  { %p1916_p3 = pnand %p1914_p2, %p1911_p1 }
 0x88b   :  { %1919 = shalt.err (!%p1916_p3)
}
 0x88c   :  { %s1937_s1 = smov 128   ;;  %s1938_s17 = smov 8  }
 0x88d   :  { %1366 = dma.vmem_to_hbm [thread:$0]  %s1361_s8, 1024, %s2487_s5, [#allocation5], %s1937_s1, %s1937_s1, %s1938_s17  }
 0x88e   :  { %1924 = dma.done.wait [#allocation5], 1024  }
 0x88f   :  { %1925 = vsyncadd [#allocation5], 4294966272 }
 0x890   :  { %1370 = vsyncpa [#allocation4], 1 }
 0x891   :  { %1371 = vsyncpa [#allocation7], 1 }
 0x892   :  { %1372 = vsyncpa [#allocation5], 1 }

</bundles_post_ra>
